<compile_context>
chip_gen: v7x
topology: tpu7x:2x2x1
jax: 0.10.0
libtpu: 0.0.40
codegen_flags: <defaults>
</compile_context>

<pallas_src>
import functools

import jax
import jax.numpy as jnp
from jax import lax
from jax.experimental import pallas as pl
from jax.experimental.pallas import tpu as pltpu


def _round_up(n, m):
    return ((n + m - 1) // m) * m


# --------------------------------- fused kernel --------------------------------


def _tcn_kernel(x_ref, w_ref, b_ref, o_ref, *, L, K, blocks):
    """Whole TemporalConvNet forward for one batch tile; everything in VMEM/vregs.

    x_ref : (batch_tile*L, Cin)  f32 temporal features, channels-last, batch folded into rows
    w_ref : (Rmax, Wtot)         bf16 packed weight slab (each weight at a 128-aligned lane offset)
    b_ref : (1, Btot)            f32 packed biases
    o_ref : (batch_tile*L, Cout_last) f32 output
    """
    blt = x_ref.shape[0]                              # rows in this tile (= batch_tile * L)

    def causal_conv(xb, cin, cout, d, w_off, b_off):
        # One dilated causal Conv1d (pad + chomp in the reference) as a single MXU
        # matmul with taps packed along N, then shifted-output accumulation.
        w = w_ref[0:cin, w_off:w_off + K * cout]                    # (cin, K*cout) bf16
        y = jnp.dot(xb, w, preferred_element_type=jnp.float32)      # (blt, K*cout) f32
        t = lax.broadcasted_iota(jnp.int32, (blt, cout), 0) % L     # time index within each sequence
        acc = None
        for k in range(K):
            s = (K - 1 - k) * d                  # causal left shift of tap k
            if s >= L:                           # this tap only ever sees the zero padding
                continue
            yk = y[:, k * cout:(k + 1) * cout]
            if s > 0:
                # out[b, t] needs tap k evaluated at time t-s; rows with t < s are the
                # causal zero padding (mask also kills the cross-sequence wraparound).
                yk = jnp.where(t >= s, pltpu.roll(yk, shift=s, axis=0), 0.0)
            acc = yk if acc is None else acc + yk
        return acc + b_ref[0:1, b_off:b_off + cout]                 # f32 epilogue

    x = x_ref[...].astype(jnp.bfloat16)          # bf16 activations; f32 epilogues below
    out = None
    for blk in blocks:                           # static Python unroll over TemporalBlocks
        cin, cout, d = blk["cin"], blk["cout"], blk["dilation"]
        h = jnp.maximum(causal_conv(x, cin, cout, d, blk["w1"], blk["b1"]), 0.0)
        h = jnp.maximum(causal_conv(h.astype(jnp.bfloat16), cout, cout, d,
                                    blk["w2"], blk["b2"]), 0.0)
        if blk["wd"] is None:                    # identity residual
            res = x.astype(jnp.float32)
        else:                                    # 1x1-conv downsample residual
            wd = w_ref[0:cin, blk["wd"]:blk["wd"] + cout]
            res = (jnp.dot(x, wd, preferred_element_type=jnp.float32)
                   + b_ref[0:1, blk["bd"]:blk["bd"] + cout])
        out = jnp.maximum(h + res, 0.0)          # relu(net(x) + res)
        x = out.astype(jnp.bfloat16)             # one cast per block for the next layer
    o_ref[...] = out.astype(o_ref.dtype)


# ------------------------------ parameter construction -------------------------


def init_params(key, num_inputs, num_channels, kernel_size):
    """Build effective (weight_norm-folded) weights packed into two DMA slabs."""
    K = kernel_size
    w_entries, b_entries = [], []                # (lane_offset, f32 array)
    w_cur, b_cur = 0, 0
    blocks, ref_blocks = [], []

    def add_weight(arr):
        nonlocal w_cur
        off = w_cur
        w_entries.append((off, arr))
        w_cur += _round_up(arr.shape[1], 128)    # 128-aligned lane slots
        return off

    def add_bias(arr):
        nonlocal b_cur
        off = b_cur
        b_entries.append((off, arr))
        b_cur += _round_up(arr.shape[0], 128)
        return off

    in_ch = num_inputs
    for i, out_ch in enumerate(num_channels):
        d = 2 ** i
        key, k1, k2, k3, kb1, kb2, kb3 = jax.random.split(key, 7)
        # Effective conv weights: N(0, 0.01) per init_weights (weight_norm folded).
        # Layout (Cin, K*Cout): column block k holds tap k (applied to x[t-(K-1-k)*d]).
        w1 = jax.random.normal(k1, (in_ch, K * out_ch), jnp.float32) * 0.01
        w2 = jax.random.normal(k2, (out_ch, K * out_ch), jnp.float32) * 0.01
        # Conv1d default bias init: U(-1/sqrt(fan_in), 1/sqrt(fan_in)), fan_in = Cin*K.
        b1 = jax.random.uniform(kb1, (out_ch,), jnp.float32, -1.0, 1.0) * (1.0 / (in_ch * K) ** 0.5)
        b2 = jax.random.uniform(kb2, (out_ch,), jnp.float32, -1.0, 1.0) * (1.0 / (out_ch * K) ** 0.5)

        blk = {"dilation": d, "cin": in_ch, "cout": out_ch,
               "w1": add_weight(w1), "b1": add_bias(b1),
               "w2": add_weight(w2), "b2": add_bias(b2),
               "wd": None, "bd": None}
        ref = {"dilation": d, "cin": in_ch, "cout": out_ch,
               "w1": w1, "b1": b1, "w2": w2, "b2": b2, "wd": None, "bd": None}
        if in_ch != out_ch:                      # 1x1 downsample conv on the residual path
            wd = jax.random.normal(k3, (in_ch, out_ch), jnp.float32) * 0.01
            bd = jax.random.uniform(kb3, (out_ch,), jnp.float32, -1.0, 1.0) * (1.0 / in_ch ** 0.5)
            blk["wd"] = add_weight(wd)
            blk["bd"] = add_bias(bd)
            ref["wd"], ref["bd"] = wd, bd
        blocks.append(blk)
        ref_blocks.append(ref)
        in_ch = out_ch

    rmax = _round_up(max(arr.shape[0] for _, arr in w_entries), 8)
    w_slab = jnp.zeros((rmax, w_cur), jnp.float32)
    for off, arr in w_entries:
        w_slab = w_slab.at[:arr.shape[0], off:off + arr.shape[1]].set(arr)
    b_slab = jnp.zeros((1, b_cur), jnp.float32)
    for off, arr in b_entries:
        b_slab = b_slab.at[0, off:off + arr.shape[0]].set(arr)

    return {"kernel_size": K,
            "blocks": tuple(blocks),                  # static python metadata for the kernel
            "w_slab": w_slab.astype(jnp.bfloat16),    # one bf16 weight DMA
            "b_slab": b_slab,                         # one f32 bias DMA
            "ref_blocks": ref_blocks}                 # f32 copies for the pure-JAX reference


# ------------------------------------ forward -----------------------------------


def temporal_conv_net_forward(params, x, *, batch_tile=None):
    """x: [B, num_inputs, L] (PyTorch NCL) -> [B, num_channels[-1], L]."""
    B, c_in, L = x.shape
    K = params["kernel_size"]
    blocks = params["blocks"]
    c_last = blocks[-1]["cout"]

    bt = B if batch_tile is None else batch_tile      # batch tile (set < B to shard on v7x)
    assert B % bt == 0 and (bt * L) % 8 == 0
    nb = B // bt

    # Channels-last, batch folded into the matmul M dim (lane-dense everywhere).
    x2d = jnp.transpose(x, (0, 2, 1)).reshape(B * L, c_in)

    flops = 0
    for blk in blocks:
        flops += 2 * B * L * K * blk["cout"] * (blk["cin"] + blk["cout"])
        if blk["wd"] is not None:
            flops += 2 * B * L * blk["cin"] * blk["cout"]
    bytes_accessed = (B * L * c_in * 4 + B * L * c_last * 4
                      + params["w_slab"].size * 2 + params["b_slab"].size * 4)

    kernel = functools.partial(_tcn_kernel, L=L, K=K, blocks=blocks)
    y2d = pl.pallas_call(
        kernel,
        out_shape=jax.ShapeDtypeStruct((B * L, c_last), jnp.float32),
        grid=(nb,),
        in_specs=[
            pl.BlockSpec((bt * L, c_in), lambda b: (b, 0)),
            pl.BlockSpec(params["w_slab"].shape, lambda b: (0, 0)),   # resident across batch tiles
            pl.BlockSpec(params["b_slab"].shape, lambda b: (0, 0)),
        ],
        out_specs=pl.BlockSpec((bt * L, c_last), lambda b: (b, 0)),
        compiler_params=pltpu.CompilerParams(dimension_semantics=("parallel",)),
        cost_estimate=pl.CostEstimate(flops=flops, transcendentals=0,
                                      bytes_accessed=bytes_accessed),
    )(x2d, params["w_slab"], params["b_slab"])

    return jnp.transpose(y2d.reshape(B, L, c_last), (0, 2, 1))


# --------------------------- pure-JAX reference (f32 pad-input) ------------------


def _ref_forward(params, x_ncl):
    """Independent pad-the-input formulation, same bf16-weight/activation precision."""
    K = params["kernel_size"]
    h = jnp.transpose(x_ncl, (0, 2, 1)).astype(jnp.float32)         # (B, L, C)
    L = h.shape[1]

    def conv(hb, w_flat, b, d, cout):
        w = w_flat.astype(jnp.bfloat16)
        out = jnp.zeros(hb.shape[:2] + (cout,), jnp.float32) + b[None, None, :]
        for k in range(K):
            s = (K - 1 - k) * d
            if s >= L:
                continue
            xk = hb if s == 0 else jnp.pad(hb, ((0, 0), (s, 0), (0, 0)))[:, :L, :]
            out = out + jnp.einsum("blc,co->blo", xk, w[:, k * cout:(k + 1) * cout],
                                   preferred_element_type=jnp.float32)
        return out

    for blk in params["ref_blocks"]:
        d, cout = blk["dilation"], blk["cout"]
        hb = h.astype(jnp.bfloat16)
        a = jnp.maximum(conv(hb, blk["w1"], blk["b1"], d, cout), 0.0)
        a = jnp.maximum(conv(a.astype(jnp.bfloat16), blk["w2"], blk["b2"], d, cout), 0.0)
        if blk["wd"] is None:
            res = hb.astype(jnp.float32)
        else:
            res = (jnp.einsum("blc,co->blo", hb, blk["wd"].astype(jnp.bfloat16),
                              preferred_element_type=jnp.float32)
                   + blk["bd"][None, None, :])
        h = jnp.maximum(a + res, 0.0)
    return jnp.transpose(h, (0, 2, 1))


# -------------------------------------- main ------------------------------------


if __name__ == "__main__":
    B, L = 2, 16
    num_inputs = 8
    num_channels = [64, 128, 128, 128]   # exercises both downsample and identity residuals
    kernel_size = 3

    key = jax.random.PRNGKey(0)
    key, kp, kx = jax.random.split(key, 3)
    params = init_params(kp, num_inputs, num_channels, kernel_size)
    x = jax.random.normal(kx, (B, num_inputs, L), jnp.float32)

    out = temporal_conv_net_forward(params, x)
    out = jax.block_until_ready(out)

    assert out.shape == (B, num_channels[-1], L), out.shape
    assert bool(jnp.all(jnp.isfinite(out)))

    ref = _ref_forward(params, x)
    rel_err = float(jnp.max(jnp.abs(out - ref)) / (jnp.max(jnp.abs(ref)) + 1e-20))
    assert rel_err < 2e-2, f"mismatch vs reference: rel_err={rel_err:.3e}"

    print("KERNEL_OK")
</pallas_src>

<mosaic_0001>
module attributes {stable_mosaic.version = 11 : i64} {
  func.func @_tcn_kernel(%arg0: i32, %arg1: memref<32x8xf32, #tpu.memory_space<vmem>>, %arg2: memref<128x3072xbf16, #tpu.memory_space<vmem>>, %arg3: memref<1x1280xf32, #tpu.memory_space<vmem>>, %arg4: memref<32x128xf32, #tpu.memory_space<vmem>>) attributes {dimension_semantics = [#tpu.dimension_semantics<parallel>], iteration_bounds = array<i64: 1>, scalar_prefetch = 0 : i64, scratch_operands = 0 : i64, tpu.core_type = #tpu.core_type<tc>, window_params = [{transform_indices = @transform_0, window_bounds = array<i64: 32, 8>}, {pipeline_mode = #tpu.pipeline_mode<synchronous>, transform_indices = @transform_1, window_bounds = array<i64: 128, 3072>}, {pipeline_mode = #tpu.pipeline_mode<synchronous>, transform_indices = @transform_2, window_bounds = array<i64: 1, 1280>}, {transform_indices = @transform_3, window_bounds = array<i64: 32, 128>}]} {
    %c0 = arith.constant 0 : index
    %c0_0 = arith.constant 0 : index
    %0 = vector.load %arg1[%c0, %c0_0] : memref<32x8xf32, #tpu.memory_space<vmem>>, vector<32x8xf32>
    %1 = arith.truncf %0 : vector<32x8xf32> to vector<32x8xbf16>
    %c0_1 = arith.constant 0 : index
    %c0_2 = arith.constant 0 : index
    %2 = vector.load %arg2[%c0_1, %c0_2] : memref<128x3072xbf16, #tpu.memory_space<vmem>>, vector<8x192xbf16>
    %cst = arith.constant dense<0.000000e+00> : vector<32x192xf32>
    %3 = tpu.matmul %1, %2, %cst {dimension_numbers = #tpu.dot_dimension_numbers<[1], [0], [0], [1], [0, 0, 1, 1], [], []>} : vector<32x8xbf16>, vector<8x192xbf16>, vector<32x192xf32> -> vector<32x192xf32>
    %4 = tpu.iota {dimensions = array<i32: 0>} : vector<32x64xi32>
    %c16_i32 = arith.constant 16 : i32
    %c0_i32 = arith.constant 0 : i32
    %5 = arith.cmpi eq, %c16_i32, %c0_i32 : i32
    %c1_i32 = arith.constant 1 : i32
    %6 = arith.select %5, %c1_i32, %c16_i32 : i32
    %7 = vector.broadcast %6 : i32 to vector<32x64xi32>
    %8 = arith.remsi %4, %7 : vector<32x64xi32>
    %c0_i32_3 = arith.constant 0 : i32
    %9 = vector.broadcast %c0_i32_3 : i32 to vector<32x64xi32>
    %10 = arith.cmpi ne, %8, %9 : vector<32x64xi32>
    %c0_i32_4 = arith.constant 0 : i32
    %11 = vector.broadcast %c0_i32_4 : i32 to vector<32x64xi32>
    %12 = arith.cmpi slt, %8, %11 : vector<32x64xi32>
    %c0_i32_5 = arith.constant 0 : i32
    %13 = arith.cmpi slt, %6, %c0_i32_5 : i32
    %14 = vector.broadcast %13 : i1 to vector<32x64xi1>
    %15 = vector.broadcast %14 : vector<32x64xi1> to vector<32x64xi1>
    %16 = arith.xori %12, %15 : vector<32x64xi1>
    %17 = arith.andi %16, %10 : vector<32x64xi1>
    %18 = vector.broadcast %6 : i32 to vector<32x64xi32>
    %19 = arith.addi %8, %18 : vector<32x64xi32>
    %20 = arith.select %17, %19, %8 : vector<32x64xi1>, vector<32x64xi32>
    %21 = vector.extract_strided_slice %3 {offsets = [0, 0], sizes = [32, 64], strides = [1, 1]} : vector<32x192xf32> to vector<32x64xf32>
    %c2_i32 = arith.constant 2 : i32
    %22 = vector.broadcast %c2_i32 : i32 to vector<32x64xi32>
    %23 = arith.cmpi sge, %20, %22 : vector<32x64xi32>
    %c2_i32_6 = arith.constant 2 : i32
    %24 = tpu.dynamic_rotate %21 by %c2_i32_6 dim 0 : vector<32x64xf32>, i32 -> vector<32x64xf32>
    %cst_7 = arith.constant 0.000000e+00 : f32
    %25 = vector.broadcast %cst_7 : f32 to vector<32x64xf32>
    %26 = arith.select %23, %24, %25 : vector<32x64xi1>, vector<32x64xf32>
    %27 = vector.extract_strided_slice %3 {offsets = [0, 64], sizes = [32, 64], strides = [1, 1]} : vector<32x192xf32> to vector<32x64xf32>
    %c1_i32_8 = arith.constant 1 : i32
    %28 = vector.broadcast %c1_i32_8 : i32 to vector<32x64xi32>
    %29 = arith.cmpi sge, %20, %28 : vector<32x64xi32>
    %c1_i32_9 = arith.constant 1 : i32
    %30 = tpu.dynamic_rotate %27 by %c1_i32_9 dim 0 : vector<32x64xf32>, i32 -> vector<32x64xf32>
    %cst_10 = arith.constant 0.000000e+00 : f32
    %31 = vector.broadcast %cst_10 : f32 to vector<32x64xf32>
    %32 = arith.select %29, %30, %31 : vector<32x64xi1>, vector<32x64xf32>
    %33 = arith.addf %26, %32 : vector<32x64xf32>
    %34 = vector.extract_strided_slice %3 {offsets = [0, 128], sizes = [32, 64], strides = [1, 1]} : vector<32x192xf32> to vector<32x64xf32>
    %35 = arith.addf %33, %34 : vector<32x64xf32>
    %c0_11 = arith.constant 0 : index
    %c0_12 = arith.constant 0 : index
    %36 = vector.load %arg3[%c0_11, %c0_12] : memref<1x1280xf32, #tpu.memory_space<vmem>>, vector<1x64xf32>
    %37 = vector.broadcast %36 : vector<1x64xf32> to vector<32x64xf32>
    %38 = arith.addf %35, %37 : vector<32x64xf32>
    %cst_13 = arith.constant 0.000000e+00 : f32
    %39 = vector.broadcast %cst_13 : f32 to vector<32x64xf32>
    %40 = arith.maximumf %38, %39 : vector<32x64xf32>
    %41 = arith.truncf %40 : vector<32x64xf32> to vector<32x64xbf16>
    %c0_14 = arith.constant 0 : index
    %c256 = arith.constant 256 : index
    %42 = vector.load %arg2[%c0_14, %c256] : memref<128x3072xbf16, #tpu.memory_space<vmem>>, vector<64x192xbf16>
    %cst_15 = arith.constant dense<0.000000e+00> : vector<32x192xf32>
    %43 = tpu.matmul %41, %42, %cst_15 {dimension_numbers = #tpu.dot_dimension_numbers<[1], [0], [0], [1], [0, 0, 1, 1], [], []>} : vector<32x64xbf16>, vector<64x192xbf16>, vector<32x192xf32> -> vector<32x192xf32>
    %44 = tpu.iota {dimensions = array<i32: 0>} : vector<32x64xi32>
    %c16_i32_16 = arith.constant 16 : i32
    %c0_i32_17 = arith.constant 0 : i32
    %45 = arith.cmpi eq, %c16_i32_16, %c0_i32_17 : i32
    %c1_i32_18 = arith.constant 1 : i32
    %46 = arith.select %45, %c1_i32_18, %c16_i32_16 : i32
    %47 = vector.broadcast %46 : i32 to vector<32x64xi32>
    %48 = arith.remsi %44, %47 : vector<32x64xi32>
    %c0_i32_19 = arith.constant 0 : i32
    %49 = vector.broadcast %c0_i32_19 : i32 to vector<32x64xi32>
    %50 = arith.cmpi ne, %48, %49 : vector<32x64xi32>
    %c0_i32_20 = arith.constant 0 : i32
    %51 = vector.broadcast %c0_i32_20 : i32 to vector<32x64xi32>
    %52 = arith.cmpi slt, %48, %51 : vector<32x64xi32>
    %c0_i32_21 = arith.constant 0 : i32
    %53 = arith.cmpi slt, %46, %c0_i32_21 : i32
    %54 = vector.broadcast %53 : i1 to vector<32x64xi1>
    %55 = vector.broadcast %54 : vector<32x64xi1> to vector<32x64xi1>
    %56 = arith.xori %52, %55 : vector<32x64xi1>
    %57 = arith.andi %56, %50 : vector<32x64xi1>
    %58 = vector.broadcast %46 : i32 to vector<32x64xi32>
    %59 = arith.addi %48, %58 : vector<32x64xi32>
    %60 = arith.select %57, %59, %48 : vector<32x64xi1>, vector<32x64xi32>
    %61 = vector.extract_strided_slice %43 {offsets = [0, 0], sizes = [32, 64], strides = [1, 1]} : vector<32x192xf32> to vector<32x64xf32>
    %c2_i32_22 = arith.constant 2 : i32
    %62 = vector.broadcast %c2_i32_22 : i32 to vector<32x64xi32>
    %63 = arith.cmpi sge, %60, %62 : vector<32x64xi32>
    %c2_i32_23 = arith.constant 2 : i32
    %64 = tpu.dynamic_rotate %61 by %c2_i32_23 dim 0 : vector<32x64xf32>, i32 -> vector<32x64xf32>
    %cst_24 = arith.constant 0.000000e+00 : f32
    %65 = vector.broadcast %cst_24 : f32 to vector<32x64xf32>
    %66 = arith.select %63, %64, %65 : vector<32x64xi1>, vector<32x64xf32>
    %67 = vector.extract_strided_slice %43 {offsets = [0, 64], sizes = [32, 64], strides = [1, 1]} : vector<32x192xf32> to vector<32x64xf32>
    %c1_i32_25 = arith.constant 1 : i32
    %68 = vector.broadcast %c1_i32_25 : i32 to vector<32x64xi32>
    %69 = arith.cmpi sge, %60, %68 : vector<32x64xi32>
    %c1_i32_26 = arith.constant 1 : i32
    %70 = tpu.dynamic_rotate %67 by %c1_i32_26 dim 0 : vector<32x64xf32>, i32 -> vector<32x64xf32>
    %cst_27 = arith.constant 0.000000e+00 : f32
    %71 = vector.broadcast %cst_27 : f32 to vector<32x64xf32>
    %72 = arith.select %69, %70, %71 : vector<32x64xi1>, vector<32x64xf32>
    %73 = arith.addf %66, %72 : vector<32x64xf32>
    %74 = vector.extract_strided_slice %43 {offsets = [0, 128], sizes = [32, 64], strides = [1, 1]} : vector<32x192xf32> to vector<32x64xf32>
    %75 = arith.addf %73, %74 : vector<32x64xf32>
    %c0_28 = arith.constant 0 : index
    %c128 = arith.constant 128 : index
    %76 = vector.load %arg3[%c0_28, %c128] : memref<1x1280xf32, #tpu.memory_space<vmem>>, vector<1x64xf32>
    %77 = vector.broadcast %76 : vector<1x64xf32> to vector<32x64xf32>
    %78 = arith.addf %75, %77 : vector<32x64xf32>
    %cst_29 = arith.constant 0.000000e+00 : f32
    %79 = vector.broadcast %cst_29 : f32 to vector<32x64xf32>
    %80 = arith.maximumf %78, %79 : vector<32x64xf32>
    %c0_30 = arith.constant 0 : index
    %c512 = arith.constant 512 : index
    %81 = vector.load %arg2[%c0_30, %c512] : memref<128x3072xbf16, #tpu.memory_space<vmem>>, vector<8x64xbf16>
    %cst_31 = arith.constant dense<0.000000e+00> : vector<32x64xf32>
    %82 = tpu.matmul %1, %81, %cst_31 {dimension_numbers = #tpu.dot_dimension_numbers<[1], [0], [0], [1], [0, 0, 1, 1], [], []>} : vector<32x8xbf16>, vector<8x64xbf16>, vector<32x64xf32> -> vector<32x64xf32>
    %c0_32 = arith.constant 0 : index
    %c256_33 = arith.constant 256 : index
    %83 = vector.load %arg3[%c0_32, %c256_33] : memref<1x1280xf32, #tpu.memory_space<vmem>>, vector<1x64xf32>
    %84 = vector.broadcast %83 : vector<1x64xf32> to vector<32x64xf32>
    %85 = arith.addf %82, %84 : vector<32x64xf32>
    %86 = arith.addf %80, %85 : vector<32x64xf32>
    %cst_34 = arith.constant 0.000000e+00 : f32
    %87 = vector.broadcast %cst_34 : f32 to vector<32x64xf32>
    %88 = arith.maximumf %86, %87 : vector<32x64xf32>
    %89 = arith.truncf %88 : vector<32x64xf32> to vector<32x64xbf16>
    %c0_35 = arith.constant 0 : index
    %c640 = arith.constant 640 : index
    %90 = vector.load %arg2[%c0_35, %c640] : memref<128x3072xbf16, #tpu.memory_space<vmem>>, vector<64x384xbf16>
    %cst_36 = arith.constant dense<0.000000e+00> : vector<32x384xf32>
    %91 = tpu.matmul %89, %90, %cst_36 {dimension_numbers = #tpu.dot_dimension_numbers<[1], [0], [0], [1], [0, 0, 1, 1], [], []>} : vector<32x64xbf16>, vector<64x384xbf16>, vector<32x384xf32> -> vector<32x384xf32>
    %92 = tpu.iota {dimensions = array<i32: 0>} : vector<32x128xi32>
    %c16_i32_37 = arith.constant 16 : i32
    %c0_i32_38 = arith.constant 0 : i32
    %93 = arith.cmpi eq, %c16_i32_37, %c0_i32_38 : i32
    %c1_i32_39 = arith.constant 1 : i32
    %94 = arith.select %93, %c1_i32_39, %c16_i32_37 : i32
    %95 = vector.broadcast %94 : i32 to vector<32x128xi32>
    %96 = arith.remsi %92, %95 : vector<32x128xi32>
    %c0_i32_40 = arith.constant 0 : i32
    %97 = vector.broadcast %c0_i32_40 : i32 to vector<32x128xi32>
    %98 = arith.cmpi ne, %96, %97 : vector<32x128xi32>
    %c0_i32_41 = arith.constant 0 : i32
    %99 = vector.broadcast %c0_i32_41 : i32 to vector<32x128xi32>
    %100 = arith.cmpi slt, %96, %99 : vector<32x128xi32>
    %c0_i32_42 = arith.constant 0 : i32
    %101 = arith.cmpi slt, %94, %c0_i32_42 : i32
    %102 = vector.broadcast %101 : i1 to vector<32x128xi1>
    %103 = vector.broadcast %102 : vector<32x128xi1> to vector<32x128xi1>
    %104 = arith.xori %100, %103 : vector<32x128xi1>
    %105 = arith.andi %104, %98 : vector<32x128xi1>
    %106 = vector.broadcast %94 : i32 to vector<32x128xi32>
    %107 = arith.addi %96, %106 : vector<32x128xi32>
    %108 = arith.select %105, %107, %96 : vector<32x128xi1>, vector<32x128xi32>
    %109 = vector.extract_strided_slice %91 {offsets = [0, 0], sizes = [32, 128], strides = [1, 1]} : vector<32x384xf32> to vector<32x128xf32>
    %c4_i32 = arith.constant 4 : i32
    %110 = vector.broadcast %c4_i32 : i32 to vector<32x128xi32>
    %111 = arith.cmpi sge, %108, %110 : vector<32x128xi32>
    %c4_i32_43 = arith.constant 4 : i32
    %112 = tpu.dynamic_rotate %109 by %c4_i32_43 dim 0 : vector<32x128xf32>, i32 -> vector<32x128xf32>
    %cst_44 = arith.constant 0.000000e+00 : f32
    %113 = vector.broadcast %cst_44 : f32 to vector<32x128xf32>
    %114 = arith.select %111, %112, %113 : vector<32x128xi1>, vector<32x128xf32>
    %115 = vector.extract_strided_slice %91 {offsets = [0, 128], sizes = [32, 128], strides = [1, 1]} : vector<32x384xf32> to vector<32x128xf32>
    %c2_i32_45 = arith.constant 2 : i32
    %116 = vector.broadcast %c2_i32_45 : i32 to vector<32x128xi32>
    %117 = arith.cmpi sge, %108, %116 : vector<32x128xi32>
    %c2_i32_46 = arith.constant 2 : i32
    %118 = tpu.dynamic_rotate %115 by %c2_i32_46 dim 0 : vector<32x128xf32>, i32 -> vector<32x128xf32>
    %cst_47 = arith.constant 0.000000e+00 : f32
    %119 = vector.broadcast %cst_47 : f32 to vector<32x128xf32>
    %120 = arith.select %117, %118, %119 : vector<32x128xi1>, vector<32x128xf32>
    %121 = arith.addf %114, %120 : vector<32x128xf32>
    %122 = vector.extract_strided_slice %91 {offsets = [0, 256], sizes = [32, 128], strides = [1, 1]} : vector<32x384xf32> to vector<32x128xf32>
    %123 = arith.addf %121, %122 : vector<32x128xf32>
    %c0_48 = arith.constant 0 : index
    %c384 = arith.constant 384 : index
    %124 = vector.load %arg3[%c0_48, %c384] : memref<1x1280xf32, #tpu.memory_space<vmem>>, vector<1x128xf32>
    %125 = vector.broadcast %124 : vector<1x128xf32> to vector<32x128xf32>
    %126 = arith.addf %123, %125 : vector<32x128xf32>
    %cst_49 = arith.constant 0.000000e+00 : f32
    %127 = vector.broadcast %cst_49 : f32 to vector<32x128xf32>
    %128 = arith.maximumf %126, %127 : vector<32x128xf32>
    %129 = arith.truncf %128 : vector<32x128xf32> to vector<32x128xbf16>
    %c0_50 = arith.constant 0 : index
    %c1024 = arith.constant 1024 : index
    %130 = vector.load %arg2[%c0_50, %c1024] : memref<128x3072xbf16, #tpu.memory_space<vmem>>, vector<128x384xbf16>
    %cst_51 = arith.constant dense<0.000000e+00> : vector<32x384xf32>
    %131 = tpu.matmul %129, %130, %cst_51 {dimension_numbers = #tpu.dot_dimension_numbers<[1], [0], [0], [1], [0, 0, 1, 1], [], []>} : vector<32x128xbf16>, vector<128x384xbf16>, vector<32x384xf32> -> vector<32x384xf32>
    %132 = tpu.iota {dimensions = array<i32: 0>} : vector<32x128xi32>
    %c16_i32_52 = arith.constant 16 : i32
    %c0_i32_53 = arith.constant 0 : i32
    %133 = arith.cmpi eq, %c16_i32_52, %c0_i32_53 : i32
    %c1_i32_54 = arith.constant 1 : i32
    %134 = arith.select %133, %c1_i32_54, %c16_i32_52 : i32
    %135 = vector.broadcast %134 : i32 to vector<32x128xi32>
    %136 = arith.remsi %132, %135 : vector<32x128xi32>
    %c0_i32_55 = arith.constant 0 : i32
    %137 = vector.broadcast %c0_i32_55 : i32 to vector<32x128xi32>
    %138 = arith.cmpi ne, %136, %137 : vector<32x128xi32>
    %c0_i32_56 = arith.constant 0 : i32
    %139 = vector.broadcast %c0_i32_56 : i32 to vector<32x128xi32>
    %140 = arith.cmpi slt, %136, %139 : vector<32x128xi32>
    %c0_i32_57 = arith.constant 0 : i32
    %141 = arith.cmpi slt, %134, %c0_i32_57 : i32
    %142 = vector.broadcast %141 : i1 to vector<32x128xi1>
    %143 = vector.broadcast %142 : vector<32x128xi1> to vector<32x128xi1>
    %144 = arith.xori %140, %143 : vector<32x128xi1>
    %145 = arith.andi %144, %138 : vector<32x128xi1>
    %146 = vector.broadcast %134 : i32 to vector<32x128xi32>
    %147 = arith.addi %136, %146 : vector<32x128xi32>
    %148 = arith.select %145, %147, %136 : vector<32x128xi1>, vector<32x128xi32>
    %149 = vector.extract_strided_slice %131 {offsets = [0, 0], sizes = [32, 128], strides = [1, 1]} : vector<32x384xf32> to vector<32x128xf32>
    %c4_i32_58 = arith.constant 4 : i32
    %150 = vector.broadcast %c4_i32_58 : i32 to vector<32x128xi32>
    %151 = arith.cmpi sge, %148, %150 : vector<32x128xi32>
    %c4_i32_59 = arith.constant 4 : i32
    %152 = tpu.dynamic_rotate %149 by %c4_i32_59 dim 0 : vector<32x128xf32>, i32 -> vector<32x128xf32>
    %cst_60 = arith.constant 0.000000e+00 : f32
    %153 = vector.broadcast %cst_60 : f32 to vector<32x128xf32>
    %154 = arith.select %151, %152, %153 : vector<32x128xi1>, vector<32x128xf32>
    %155 = vector.extract_strided_slice %131 {offsets = [0, 128], sizes = [32, 128], strides = [1, 1]} : vector<32x384xf32> to vector<32x128xf32>
    %c2_i32_61 = arith.constant 2 : i32
    %156 = vector.broadcast %c2_i32_61 : i32 to vector<32x128xi32>
    %157 = arith.cmpi sge, %148, %156 : vector<32x128xi32>
    %c2_i32_62 = arith.constant 2 : i32
    %158 = tpu.dynamic_rotate %155 by %c2_i32_62 dim 0 : vector<32x128xf32>, i32 -> vector<32x128xf32>
    %cst_63 = arith.constant 0.000000e+00 : f32
    %159 = vector.broadcast %cst_63 : f32 to vector<32x128xf32>
    %160 = arith.select %157, %158, %159 : vector<32x128xi1>, vector<32x128xf32>
    %161 = arith.addf %154, %160 : vector<32x128xf32>
    %162 = vector.extract_strided_slice %131 {offsets = [0, 256], sizes = [32, 128], strides = [1, 1]} : vector<32x384xf32> to vector<32x128xf32>
    %163 = arith.addf %161, %162 : vector<32x128xf32>
    %c0_64 = arith.constant 0 : index
    %c512_65 = arith.constant 512 : index
    %164 = vector.load %arg3[%c0_64, %c512_65] : memref<1x1280xf32, #tpu.memory_space<vmem>>, vector<1x128xf32>
    %165 = vector.broadcast %164 : vector<1x128xf32> to vector<32x128xf32>
    %166 = arith.addf %163, %165 : vector<32x128xf32>
    %cst_66 = arith.constant 0.000000e+00 : f32
    %167 = vector.broadcast %cst_66 : f32 to vector<32x128xf32>
    %168 = arith.maximumf %166, %167 : vector<32x128xf32>
    %c0_67 = arith.constant 0 : index
    %c1408 = arith.constant 1408 : index
    %169 = vector.load %arg2[%c0_67, %c1408] : memref<128x3072xbf16, #tpu.memory_space<vmem>>, vector<64x128xbf16>
    %cst_68 = arith.constant dense<0.000000e+00> : vector<32x128xf32>
    %170 = tpu.matmul %89, %169, %cst_68 {dimension_numbers = #tpu.dot_dimension_numbers<[1], [0], [0], [1], [0, 0, 1, 1], [], []>} : vector<32x64xbf16>, vector<64x128xbf16>, vector<32x128xf32> -> vector<32x128xf32>
    %c0_69 = arith.constant 0 : index
    %c640_70 = arith.constant 640 : index
    %171 = vector.load %arg3[%c0_69, %c640_70] : memref<1x1280xf32, #tpu.memory_space<vmem>>, vector<1x128xf32>
    %172 = vector.broadcast %171 : vector<1x128xf32> to vector<32x128xf32>
    %173 = arith.addf %170, %172 : vector<32x128xf32>
    %174 = arith.addf %168, %173 : vector<32x128xf32>
    %cst_71 = arith.constant 0.000000e+00 : f32
    %175 = vector.broadcast %cst_71 : f32 to vector<32x128xf32>
    %176 = arith.maximumf %174, %175 : vector<32x128xf32>
    %177 = arith.truncf %176 : vector<32x128xf32> to vector<32x128xbf16>
    %c0_72 = arith.constant 0 : index
    %c1536 = arith.constant 1536 : index
    %178 = vector.load %arg2[%c0_72, %c1536] : memref<128x3072xbf16, #tpu.memory_space<vmem>>, vector<128x384xbf16>
    %cst_73 = arith.constant dense<0.000000e+00> : vector<32x384xf32>
    %179 = tpu.matmul %177, %178, %cst_73 {dimension_numbers = #tpu.dot_dimension_numbers<[1], [0], [0], [1], [0, 0, 1, 1], [], []>} : vector<32x128xbf16>, vector<128x384xbf16>, vector<32x384xf32> -> vector<32x384xf32>
    %180 = tpu.iota {dimensions = array<i32: 0>} : vector<32x128xi32>
    %c16_i32_74 = arith.constant 16 : i32
    %c0_i32_75 = arith.constant 0 : i32
    %181 = arith.cmpi eq, %c16_i32_74, %c0_i32_75 : i32
    %c1_i32_76 = arith.constant 1 : i32
    %182 = arith.select %181, %c1_i32_76, %c16_i32_74 : i32
    %183 = vector.broadcast %182 : i32 to vector<32x128xi32>
    %184 = arith.remsi %180, %183 : vector<32x128xi32>
    %c0_i32_77 = arith.constant 0 : i32
    %185 = vector.broadcast %c0_i32_77 : i32 to vector<32x128xi32>
    %186 = arith.cmpi ne, %184, %185 : vector<32x128xi32>
    %c0_i32_78 = arith.constant 0 : i32
    %187 = vector.broadcast %c0_i32_78 : i32 to vector<32x128xi32>
    %188 = arith.cmpi slt, %184, %187 : vector<32x128xi32>
    %c0_i32_79 = arith.constant 0 : i32
    %189 = arith.cmpi slt, %182, %c0_i32_79 : i32
    %190 = vector.broadcast %189 : i1 to vector<32x128xi1>
    %191 = vector.broadcast %190 : vector<32x128xi1> to vector<32x128xi1>
    %192 = arith.xori %188, %191 : vector<32x128xi1>
    %193 = arith.andi %192, %186 : vector<32x128xi1>
    %194 = vector.broadcast %182 : i32 to vector<32x128xi32>
    %195 = arith.addi %184, %194 : vector<32x128xi32>
    %196 = arith.select %193, %195, %184 : vector<32x128xi1>, vector<32x128xi32>
    %197 = vector.extract_strided_slice %179 {offsets = [0, 0], sizes = [32, 128], strides = [1, 1]} : vector<32x384xf32> to vector<32x128xf32>
    %c8_i32 = arith.constant 8 : i32
    %198 = vector.broadcast %c8_i32 : i32 to vector<32x128xi32>
    %199 = arith.cmpi sge, %196, %198 : vector<32x128xi32>
    %c8_i32_80 = arith.constant 8 : i32
    %200 = tpu.dynamic_rotate %197 by %c8_i32_80 dim 0 : vector<32x128xf32>, i32 -> vector<32x128xf32>
    %cst_81 = arith.constant 0.000000e+00 : f32
    %201 = vector.broadcast %cst_81 : f32 to vector<32x128xf32>
    %202 = arith.select %199, %200, %201 : vector<32x128xi1>, vector<32x128xf32>
    %203 = vector.extract_strided_slice %179 {offsets = [0, 128], sizes = [32, 128], strides = [1, 1]} : vector<32x384xf32> to vector<32x128xf32>
    %c4_i32_82 = arith.constant 4 : i32
    %204 = vector.broadcast %c4_i32_82 : i32 to vector<32x128xi32>
    %205 = arith.cmpi sge, %196, %204 : vector<32x128xi32>
    %c4_i32_83 = arith.constant 4 : i32
    %206 = tpu.dynamic_rotate %203 by %c4_i32_83 dim 0 : vector<32x128xf32>, i32 -> vector<32x128xf32>
    %cst_84 = arith.constant 0.000000e+00 : f32
    %207 = vector.broadcast %cst_84 : f32 to vector<32x128xf32>
    %208 = arith.select %205, %206, %207 : vector<32x128xi1>, vector<32x128xf32>
    %209 = arith.addf %202, %208 : vector<32x128xf32>
    %210 = vector.extract_strided_slice %179 {offsets = [0, 256], sizes = [32, 128], strides = [1, 1]} : vector<32x384xf32> to vector<32x128xf32>
    %211 = arith.addf %209, %210 : vector<32x128xf32>
    %c0_85 = arith.constant 0 : index
    %c768 = arith.constant 768 : index
    %212 = vector.load %arg3[%c0_85, %c768] : memref<1x1280xf32, #tpu.memory_space<vmem>>, vector<1x128xf32>
    %213 = vector.broadcast %212 : vector<1x128xf32> to vector<32x128xf32>
    %214 = arith.addf %211, %213 : vector<32x128xf32>
    %cst_86 = arith.constant 0.000000e+00 : f32
    %215 = vector.broadcast %cst_86 : f32 to vector<32x128xf32>
    %216 = arith.maximumf %214, %215 : vector<32x128xf32>
    %217 = arith.truncf %216 : vector<32x128xf32> to vector<32x128xbf16>
    %c0_87 = arith.constant 0 : index
    %c1920 = arith.constant 1920 : index
    %218 = vector.load %arg2[%c0_87, %c1920] : memref<128x3072xbf16, #tpu.memory_space<vmem>>, vector<128x384xbf16>
    %cst_88 = arith.constant dense<0.000000e+00> : vector<32x384xf32>
    %219 = tpu.matmul %217, %218, %cst_88 {dimension_numbers = #tpu.dot_dimension_numbers<[1], [0], [0], [1], [0, 0, 1, 1], [], []>} : vector<32x128xbf16>, vector<128x384xbf16>, vector<32x384xf32> -> vector<32x384xf32>
    %220 = tpu.iota {dimensions = array<i32: 0>} : vector<32x128xi32>
    %c16_i32_89 = arith.constant 16 : i32
    %c0_i32_90 = arith.constant 0 : i32
    %221 = arith.cmpi eq, %c16_i32_89, %c0_i32_90 : i32
    %c1_i32_91 = arith.constant 1 : i32
    %222 = arith.select %221, %c1_i32_91, %c16_i32_89 : i32
    %223 = vector.broadcast %222 : i32 to vector<32x128xi32>
    %224 = arith.remsi %220, %223 : vector<32x128xi32>
    %c0_i32_92 = arith.constant 0 : i32
    %225 = vector.broadcast %c0_i32_92 : i32 to vector<32x128xi32>
    %226 = arith.cmpi ne, %224, %225 : vector<32x128xi32>
    %c0_i32_93 = arith.constant 0 : i32
    %227 = vector.broadcast %c0_i32_93 : i32 to vector<32x128xi32>
    %228 = arith.cmpi slt, %224, %227 : vector<32x128xi32>
    %c0_i32_94 = arith.constant 0 : i32
    %229 = arith.cmpi slt, %222, %c0_i32_94 : i32
    %230 = vector.broadcast %229 : i1 to vector<32x128xi1>
    %231 = vector.broadcast %230 : vector<32x128xi1> to vector<32x128xi1>
    %232 = arith.xori %228, %231 : vector<32x128xi1>
    %233 = arith.andi %232, %226 : vector<32x128xi1>
    %234 = vector.broadcast %222 : i32 to vector<32x128xi32>
    %235 = arith.addi %224, %234 : vector<32x128xi32>
    %236 = arith.select %233, %235, %224 : vector<32x128xi1>, vector<32x128xi32>
    %237 = vector.extract_strided_slice %219 {offsets = [0, 0], sizes = [32, 128], strides = [1, 1]} : vector<32x384xf32> to vector<32x128xf32>
    %c8_i32_95 = arith.constant 8 : i32
    %238 = vector.broadcast %c8_i32_95 : i32 to vector<32x128xi32>
    %239 = arith.cmpi sge, %236, %238 : vector<32x128xi32>
    %c8_i32_96 = arith.constant 8 : i32
    %240 = tpu.dynamic_rotate %237 by %c8_i32_96 dim 0 : vector<32x128xf32>, i32 -> vector<32x128xf32>
    %cst_97 = arith.constant 0.000000e+00 : f32
    %241 = vector.broadcast %cst_97 : f32 to vector<32x128xf32>
    %242 = arith.select %239, %240, %241 : vector<32x128xi1>, vector<32x128xf32>
    %243 = vector.extract_strided_slice %219 {offsets = [0, 128], sizes = [32, 128], strides = [1, 1]} : vector<32x384xf32> to vector<32x128xf32>
    %c4_i32_98 = arith.constant 4 : i32
    %244 = vector.broadcast %c4_i32_98 : i32 to vector<32x128xi32>
    %245 = arith.cmpi sge, %236, %244 : vector<32x128xi32>
    %c4_i32_99 = arith.constant 4 : i32
    %246 = tpu.dynamic_rotate %243 by %c4_i32_99 dim 0 : vector<32x128xf32>, i32 -> vector<32x128xf32>
    %cst_100 = arith.constant 0.000000e+00 : f32
    %247 = vector.broadcast %cst_100 : f32 to vector<32x128xf32>
    %248 = arith.select %245, %246, %247 : vector<32x128xi1>, vector<32x128xf32>
    %249 = arith.addf %242, %248 : vector<32x128xf32>
    %250 = vector.extract_strided_slice %219 {offsets = [0, 256], sizes = [32, 128], strides = [1, 1]} : vector<32x384xf32> to vector<32x128xf32>
    %251 = arith.addf %249, %250 : vector<32x128xf32>
    %c0_101 = arith.constant 0 : index
    %c896 = arith.constant 896 : index
    %252 = vector.load %arg3[%c0_101, %c896] : memref<1x1280xf32, #tpu.memory_space<vmem>>, vector<1x128xf32>
    %253 = vector.broadcast %252 : vector<1x128xf32> to vector<32x128xf32>
    %254 = arith.addf %251, %253 : vector<32x128xf32>
    %cst_102 = arith.constant 0.000000e+00 : f32
    %255 = vector.broadcast %cst_102 : f32 to vector<32x128xf32>
    %256 = arith.maximumf %254, %255 : vector<32x128xf32>
    %257 = arith.extf %177 : vector<32x128xbf16> to vector<32x128xf32>
    %258 = arith.addf %256, %257 : vector<32x128xf32>
    %cst_103 = arith.constant 0.000000e+00 : f32
    %259 = vector.broadcast %cst_103 : f32 to vector<32x128xf32>
    %260 = arith.maximumf %258, %259 : vector<32x128xf32>
    %261 = arith.truncf %260 : vector<32x128xf32> to vector<32x128xbf16>
    %c0_104 = arith.constant 0 : index
    %c2304 = arith.constant 2304 : index
    %262 = vector.load %arg2[%c0_104, %c2304] : memref<128x3072xbf16, #tpu.memory_space<vmem>>, vector<128x384xbf16>
    %cst_105 = arith.constant dense<0.000000e+00> : vector<32x384xf32>
    %263 = tpu.matmul %261, %262, %cst_105 {dimension_numbers = #tpu.dot_dimension_numbers<[1], [0], [0], [1], [0, 0, 1, 1], [], []>} : vector<32x128xbf16>, vector<128x384xbf16>, vector<32x384xf32> -> vector<32x384xf32>
    %264 = tpu.iota {dimensions = array<i32: 0>} : vector<32x128xi32>
    %c16_i32_106 = arith.constant 16 : i32
    %c0_i32_107 = arith.constant 0 : i32
    %265 = arith.cmpi eq, %c16_i32_106, %c0_i32_107 : i32
    %c1_i32_108 = arith.constant 1 : i32
    %266 = arith.select %265, %c1_i32_108, %c16_i32_106 : i32
    %267 = vector.broadcast %266 : i32 to vector<32x128xi32>
    %268 = arith.remsi %264, %267 : vector<32x128xi32>
    %c0_i32_109 = arith.constant 0 : i32
    %269 = vector.broadcast %c0_i32_109 : i32 to vector<32x128xi32>
    %270 = arith.cmpi ne, %268, %269 : vector<32x128xi32>
    %c0_i32_110 = arith.constant 0 : i32
    %271 = vector.broadcast %c0_i32_110 : i32 to vector<32x128xi32>
    %272 = arith.cmpi slt, %268, %271 : vector<32x128xi32>
    %c0_i32_111 = arith.constant 0 : i32
    %273 = arith.cmpi slt, %266, %c0_i32_111 : i32
    %274 = vector.broadcast %273 : i1 to vector<32x128xi1>
    %275 = vector.broadcast %274 : vector<32x128xi1> to vector<32x128xi1>
    %276 = arith.xori %272, %275 : vector<32x128xi1>
    %277 = arith.andi %276, %270 : vector<32x128xi1>
    %278 = vector.broadcast %266 : i32 to vector<32x128xi32>
    %279 = arith.addi %268, %278 : vector<32x128xi32>
    %280 = arith.select %277, %279, %268 : vector<32x128xi1>, vector<32x128xi32>
    %281 = vector.extract_strided_slice %263 {offsets = [0, 128], sizes = [32, 128], strides = [1, 1]} : vector<32x384xf32> to vector<32x128xf32>
    %c8_i32_112 = arith.constant 8 : i32
    %282 = vector.broadcast %c8_i32_112 : i32 to vector<32x128xi32>
    %283 = arith.cmpi sge, %280, %282 : vector<32x128xi32>
    %c8_i32_113 = arith.constant 8 : i32
    %284 = tpu.dynamic_rotate %281 by %c8_i32_113 dim 0 : vector<32x128xf32>, i32 -> vector<32x128xf32>
    %cst_114 = arith.constant 0.000000e+00 : f32
    %285 = vector.broadcast %cst_114 : f32 to vector<32x128xf32>
    %286 = arith.select %283, %284, %285 : vector<32x128xi1>, vector<32x128xf32>
    %287 = vector.extract_strided_slice %263 {offsets = [0, 256], sizes = [32, 128], strides = [1, 1]} : vector<32x384xf32> to vector<32x128xf32>
    %288 = arith.addf %286, %287 : vector<32x128xf32>
    %c0_115 = arith.constant 0 : index
    %c1024_116 = arith.constant 1024 : index
    %289 = vector.load %arg3[%c0_115, %c1024_116] : memref<1x1280xf32, #tpu.memory_space<vmem>>, vector<1x128xf32>
    %290 = vector.broadcast %289 : vector<1x128xf32> to vector<32x128xf32>
    %291 = arith.addf %288, %290 : vector<32x128xf32>
    %cst_117 = arith.constant 0.000000e+00 : f32
    %292 = vector.broadcast %cst_117 : f32 to vector<32x128xf32>
    %293 = arith.maximumf %291, %292 : vector<32x128xf32>
    %294 = arith.truncf %293 : vector<32x128xf32> to vector<32x128xbf16>
    %c0_118 = arith.constant 0 : index
    %c2688 = arith.constant 2688 : index
    %295 = vector.load %arg2[%c0_118, %c2688] : memref<128x3072xbf16, #tpu.memory_space<vmem>>, vector<128x384xbf16>
    %cst_119 = arith.constant dense<0.000000e+00> : vector<32x384xf32>
    %296 = tpu.matmul %294, %295, %cst_119 {dimension_numbers = #tpu.dot_dimension_numbers<[1], [0], [0], [1], [0, 0, 1, 1], [], []>} : vector<32x128xbf16>, vector<128x384xbf16>, vector<32x384xf32> -> vector<32x384xf32>
    %297 = tpu.iota {dimensions = array<i32: 0>} : vector<32x128xi32>
    %c16_i32_120 = arith.constant 16 : i32
    %c0_i32_121 = arith.constant 0 : i32
    %298 = arith.cmpi eq, %c16_i32_120, %c0_i32_121 : i32
    %c1_i32_122 = arith.constant 1 : i32
    %299 = arith.select %298, %c1_i32_122, %c16_i32_120 : i32
    %300 = vector.broadcast %299 : i32 to vector<32x128xi32>
    %301 = arith.remsi %297, %300 : vector<32x128xi32>
    %c0_i32_123 = arith.constant 0 : i32
    %302 = vector.broadcast %c0_i32_123 : i32 to vector<32x128xi32>
    %303 = arith.cmpi ne, %301, %302 : vector<32x128xi32>
    %c0_i32_124 = arith.constant 0 : i32
    %304 = vector.broadcast %c0_i32_124 : i32 to vector<32x128xi32>
    %305 = arith.cmpi slt, %301, %304 : vector<32x128xi32>
    %c0_i32_125 = arith.constant 0 : i32
    %306 = arith.cmpi slt, %299, %c0_i32_125 : i32
    %307 = vector.broadcast %306 : i1 to vector<32x128xi1>
    %308 = vector.broadcast %307 : vector<32x128xi1> to vector<32x128xi1>
    %309 = arith.xori %305, %308 : vector<32x128xi1>
    %310 = arith.andi %309, %303 : vector<32x128xi1>
    %311 = vector.broadcast %299 : i32 to vector<32x128xi32>
    %312 = arith.addi %301, %311 : vector<32x128xi32>
    %313 = arith.select %310, %312, %301 : vector<32x128xi1>, vector<32x128xi32>
    %314 = vector.extract_strided_slice %296 {offsets = [0, 128], sizes = [32, 128], strides = [1, 1]} : vector<32x384xf32> to vector<32x128xf32>
    %c8_i32_126 = arith.constant 8 : i32
    %315 = vector.broadcast %c8_i32_126 : i32 to vector<32x128xi32>
    %316 = arith.cmpi sge, %313, %315 : vector<32x128xi32>
    %c8_i32_127 = arith.constant 8 : i32
    %317 = tpu.dynamic_rotate %314 by %c8_i32_127 dim 0 : vector<32x128xf32>, i32 -> vector<32x128xf32>
    %cst_128 = arith.constant 0.000000e+00 : f32
    %318 = vector.broadcast %cst_128 : f32 to vector<32x128xf32>
    %319 = arith.select %316, %317, %318 : vector<32x128xi1>, vector<32x128xf32>
    %320 = vector.extract_strided_slice %296 {offsets = [0, 256], sizes = [32, 128], strides = [1, 1]} : vector<32x384xf32> to vector<32x128xf32>
    %321 = arith.addf %319, %320 : vector<32x128xf32>
    %c0_129 = arith.constant 0 : index
    %c1152 = arith.constant 1152 : index
    %322 = vector.load %arg3[%c0_129, %c1152] : memref<1x1280xf32, #tpu.memory_space<vmem>>, vector<1x128xf32>
    %323 = vector.broadcast %322 : vector<1x128xf32> to vector<32x128xf32>
    %324 = arith.addf %321, %323 : vector<32x128xf32>
    %cst_130 = arith.constant 0.000000e+00 : f32
    %325 = vector.broadcast %cst_130 : f32 to vector<32x128xf32>
    %326 = arith.maximumf %324, %325 : vector<32x128xf32>
    %327 = arith.extf %261 : vector<32x128xbf16> to vector<32x128xf32>
    %328 = arith.addf %326, %327 : vector<32x128xf32>
    %cst_131 = arith.constant 0.000000e+00 : f32
    %329 = vector.broadcast %cst_131 : f32 to vector<32x128xf32>
    %330 = arith.maximumf %328, %329 : vector<32x128xf32>
    %c0_132 = arith.constant 0 : index
    %c0_133 = arith.constant 0 : index
    %331 = vector.load %arg4[%c0_132, %c0_133] : memref<32x128xf32, #tpu.memory_space<vmem>>, vector<32x128xf32>
    tpu.vector_store %arg4[%c0_132, %c0_133], %330 {strides = array<i32>} : memref<32x128xf32, #tpu.memory_space<vmem>>, vector<32x128xf32>,
    return
  }
  func.func @transform_0(%arg0: i32) -> (i32, i32) {
    %c0_i32 = arith.constant 0 : i32
    %c0_i32_0 = arith.constant 0 : i32
    return %arg0, %c0_i32 : i32, i32
  }
  func.func @transform_1(%arg0: i32) -> (i32, i32) {
    %c0_i32 = arith.constant 0 : i32
    %c0_i32_0 = arith.constant 0 : i32
    %c0_i32_1 = arith.constant 0 : i32
    return %c0_i32, %c0_i32_0 : i32, i32
  }
  func.func @transform_2(%arg0: i32) -> (i32, i32) {
    %c0_i32 = arith.constant 0 : i32
    %c0_i32_0 = arith.constant 0 : i32
    %c0_i32_1 = arith.constant 0 : i32
    return %c0_i32, %c0_i32_0 : i32, i32
  }
  func.func @transform_3(%arg0: i32) -> (i32, i32) {
    %c0_i32 = arith.constant 0 : i32
    %c0_i32_0 = arith.constant 0 : i32
    return %arg0, %c0_i32 : i32, i32
  }
}

</mosaic_0001>

<bundles_post_ra>
// kernel: tpu_custom_call.1
= control target key start
LH: loop header
LB: loop body
LE: loop exit
PB: predicated region body
PF: predicated region fallthrough
CT: control target
= control target key end

     0   :  { %8 = vsyncpa [#allocation3], 0  ;;  %s3155_s0 = inlined_call_operand.vmem [shape: f32[32,8], index: 0, kind: input, shape index: {}]   ;;  %s3156_s1 = inlined_call_operand.hbm [shape: bf16[128,3072], index: 1, kind: input, shape index: {}]   ;;  %s3157_s2 = inlined_call_operand.vmem [shape: f32[1,1280], index: 2, kind: input, shape index: {}]   ;;  %s3158_s3 = inlined_call_operand.hbm [shape: f32[32,128], index: 3, kind: output, shape index: {}]  }
   0x1   :  { %9 = vsyncpa [#allocation4], 0  ;;  %s2769_s12 = smov [#allocation2]   ;;  %s2721_s16 = scalar_lea.hbm %s3156_s1, 24576 }
   0x2   :  { %s17_s13 = sshll.u32 %s2769_s12, 4  ;;  %p2722_p0 = scmp.ne.s32.totalorder %s3156_s1, %s2721_s16  ;;  %s18_s13 = int_to_ptr.vmem [resolvable:$true] %s17_s13 }
   0x3   :  { %p2725_p1 = scmp.lt.u32.totalorder %s2721_s16, %s3156_s1 }
   0x5   :  { %p2727_p2 = pnand %p2725_p1, %p2722_p0 }
   0x7   :  { %2730 = shalt.err (!%p2727_p2)
}
   0x8   :  { %s2731_s21 = scalar_lea.vmem %s18_s13, 24576  ;;  %p2736_p4 = scmp.lt.s32.totalorder %s18_s13, %s18_s13 }
   0x9   :  { %p2732_p3 = scmp.ne.s32.totalorder %s18_s13, %s2731_s21  ;;  %p2737_p5 = scmp.lt.s32.totalorder %s2731_s21, %s2731_s21 }
   0xb   :  { %p2738_p6 = por %p2737_p5, %p2736_p4 }
   0xd   :  { %p2739_p7 = pnand %p2738_p6, %p2732_p3 }
   0xf   :  { %2742 = shalt.err (!%p2739_p7)
}
  0x10   :  { %s2770_s22 = smov 1536   ;;  %s2771_s23 = smov 96  }
  0x11   :  { %23 = dma.hbm_to_vmem [thread:$0]  %s3156_s1, 24576, %s18_s13, [#allocation3], %s2770_s22, %s2770_s22, %s2771_s23  }
  0x12   :  { %2765 = dma.done.wait [#allocation3], 24576  }
  0x13   :  { %2766 = vsyncadd [#allocation3], 4294942720  ;;  %v2772_v0 = vmov 0   ;;  %v36_v1 = vld [vmem:[#allocation2] sm:$0xff]  ;;  %vm49_vm0 = vcmask 1043456   ;;  %v30_v2 = vld [vmem:[%s3155_s0] sm:$0xff]  ;;  %v109_v13 = vlaneseq }
  0x14   :  { %88 = vmatprep.mubr.bf16.mxu0 %v2772_v0  ;;  %324 = vmatprep.mubr.bf16.mxu1 %v2772_v0  ;;  %v31_v3 = vld [vmem:[%s3155_s0 + $0x8] sm:$0xff]  ;;  %v2347_v4 = vcombine.high %v36_v1, %v36_v1  ;;  %v2346_v5 = vcombine.low %v36_v1, %v36_v1  ;;  %vm42_vm1 = vcmask 64512   ;;  %v32_v8 = vld [vmem:[%s3155_s0 + $0x10] sm:$0xff]  ;;  %v33_v9 = vld [vmem:[%s3155_s0 + $0x18] sm:$0xff]  ;;  %s2773_s0 = smov 64   ;;  %vm285_vm8 = vcmask 523264  }
  0x15   :  { %v34_v7 = vpack.c.bf16 %v31_v3, %v30_v2  ;;  %v35_v10 = vpack.c.bf16 %v33_v9, %v32_v8  ;;  %v237_v11 = vld [vmem:[#allocation2 + $0x8] sm:$0xff]  ;;  %v2829_v18 = vshrl.u32 %v109_v13, 7  ;;  %v408_v45 = vld [vmem:[#allocation2 + $0x10] sm:$0xf] }
  0x16   :  { %2348 = vmatprep.subr.msk.bf16.mxu0 %vm49_vm0, %v2347_v4  ;;  %v51_v6 = vsel %vm49_vm0, %v2346_v5, 0  ;;  %v238_v12 = vld [vmem:[#allocation2 + $0x68] sm:$0xff]  ;;  %v417_v46 = vsel %vm49_vm0, %v408_v45, 0 }
  0x17   :  { %57 = vmatpush1.bf16.msra.mxu0 %v51_v6  ;;  %v2353_v14 = vcombine.high %v237_v11, %v238_v12  ;;  %v2352_v15 = vcombine.low %v237_v11, %v238_v12  ;;  %v239_v16 = vld [vmem:[#allocation2 + $0xc8] sm:$0xff]  ;;  %vm170_vm2 = vcmp.lt.s32.totalorder %v2829_v18, 2  ;;  %v112_v48 = vadd.s32 16, %v2829_v18 }
  0x18   :  { %v240_v17 = vld [vmem:[#allocation2 + $0x128] sm:$0xff]  ;;  %2710 = vmatprep.subr.msk.bf16.mxu0 %vm49_vm0, %v408_v45  ;;  %vm203_vm3 = vcmp.lt.s32.totalorder %v2829_v18, 1  ;;  %v2856_v55 = vand.u32 15, %v2829_v18  ;;  %v486_v45 = vld [vmem:[#allocation2 + $0x194] sm:$0xff]  ;;  %vm674_vm9 = vcmp.lt.s32.totalorder %v2829_v18, 4 }
  0x19   :  { %292 = vmatprep.subr.bf16.mxu1 %v2353_v14  ;;  %v2355_v19 = vcombine.high %v239_v16, %v240_v17  ;;  %v2354_v20 = vcombine.low %v239_v16, %v240_v17  ;;  %v241_v23 = vld [vmem:[#allocation2 + $0x188] sm:$0xff]  ;;  %v2851_v52 = vand.u32 15, %v112_v48 }
  0x1a   :  { %2349 = vmatmul.mubr.msk.bf16.vlgmr.msra.gmra.mrb[0].mxu0 %vm42_vm1, %v34_v7  ;;  %293 = vmatpush1.bf16.msra.mxu1 %v2352_v15  ;;  %v242_v24 = vld [vmem:[#allocation2 + $0x1e8] sm:$0xff]  ;;  %vm162_vm6 = vcmp.ge.s32.totalorder %v2856_v55, 2  ;;  %vm179_vm7 = vcmp.ge.s32.totalorder %v2856_v55, 1  ;;  %vm666_vm11 = vcmp.ge.s32.totalorder %v2856_v55, 4  ;;  %v2036_v55 = vld [vmem:[#allocation2 + $0x114] sm:$0xff] }
  0x1b   :  { %98 = vmatprep.mubr.bf16.mxu0 %v2772_v0  ;;  %294 = vmatprep.subr.bf16.mxu1 %v2355_v19  ;;  %v2357_v26 = vcombine.high %v241_v23, %v242_v24  ;;  %v2356_v30 = vcombine.low %v241_v23, %v242_v24  ;;  %v243_v31 = vld [vmem:[#allocation2 + $0x248] sm:$0xff]  ;;  %vm164_vm4 = vcmp.ge.s32.totalorder %v2851_v52, 2  ;;  %vm181_vm5 = vcmp.ge.s32.totalorder %v2851_v52, 1  ;;  %v478_v24 = vld [vmem:[#allocation2 + $0x14] sm:$0xff] }
  0x1c   :  { %v244_v32 = vld [vmem:[#allocation2 + $0x2a8] sm:$0xff]  ;;  %2581 = vmatpush3.bf16.msra.mxu0 %v417_v46  ;;  %v488_v46 = vld [vmem:[#allocation2 + $0x1f4] sm:$0xff]  ;;  %vm668_vm10 = vcmp.ge.s32.totalorder %v2851_v52, 4 }
  0x1d   :  { %v2359_v34 = vcombine.high %v243_v31, %v244_v32  ;;  %v2358_v35 = vcombine.low %v243_v31, %v244_v32  ;;  %v2373_v48 = vcombine.high %v486_v45, %v488_v46 }
  0x1e   :  { %295 = vmatpush1.bf16.msra.mxu1 %v2354_v20 }
  0x1f   :  { %296 = vmatprep.subr.bf16.mxu1 %v2357_v26 }
  0x22   :  { %2350 = vmatmul.mubr.msk.bf16.gmra.mrb[4].mxu0 %vm42_vm1, %v35_v10  ;;  %297 = vmatpush1.bf16.msra.mxu1 %v2356_v30 }
  0x23   :  { %2582 = vmatprep.mubr.msk.bf16.mxu0 %vm42_vm1, %v34_v7  ;;  %298 = vmatprep.subr.bf16.mxu1 %v2359_v34  ;;  %v2351_v7 = vld [vmem:[%s3157_s2] ss:$0 sm:$0xff]  ;;  %v484_v34 = vld [vmem:[#allocation2 + $0x134] sm:$0xff] }
  0x26   :  { %299 = vmatpush1.bf16.msra.mxu1 %v2358_v35  ;;  %v479_v35 = vld [vmem:[#allocation2 + $0x1c] sm:$0xf] }
  0x2a   :  { %2583 = vmatmul.mubr.msk.bf16.vlgmr.msra.gmra.mrb[8].mxu0 %vm42_vm1, %v35_v10 }
  0xed   :  { %v90_v21 = vpop.f32.mrb[0].mxu0 }
  0xee   :  { %187 = vrot.lane.b32.xlu0 %v90_v21, %s2773_s0  ;;  %v2832_v22 = vpop.f32.mrb[1].mxu0  ;;  %v166_v27 = vrot.slane %v90_v21, 6 }
  0xef   :  { %v94_v25 = vpop.f32.mrb[2].mxu0 }
  0xf0   :  { %v167_v28 = vrot.slane %v94_v25, 6  ;;  %189 = vrot.lane.b32.xlu1 %v94_v25, %s2773_s0  ;;  %v96_v29 = vpop.f32.mrb[3].mxu0  ;;  %v480_v25 = vld [vmem:[#allocation2 + $0x74] sm:$0xff] }
  0xf2   :  { %v173_v33 = vsel %vm170_vm2, %v166_v27, %v167_v28 }
  0xf5   :  { %v100_v36 = vpop.f32.mrb[4].mxu0 }
  0xf6   :  { %v168_v37 = vrot.slane %v100_v36, 6  ;;  %191 = vrot.lane.b32.xlu1 %v100_v36, %s2773_s0  ;;  %v102_v38 = vpop.f32.mrb[5].mxu0 }
  0xf7   :  { %v104_v39 = vpop.f32.mrb[6].mxu0 }
  0xf8   :  { %v172_v40 = vsel %vm170_vm2, %v167_v28, %v168_v37  ;;  %v169_v41 = vrot.slane %v104_v39, 6  ;;  %193 = vrot.lane.b32.xlu0 %v104_v39, %s2773_s0  ;;  %v106_v42 = vpop.f32.mrb[7].mxu0 }
  0xf9   :  { %v177_v62 = vsel %vm164_vm4, %v172_v40, 0.0 }
  0xfa   :  { %v171_v43 = vsel %vm170_vm2, %v168_v37, %v169_v41  ;;  %v174_v44 = vsel %vm170_vm2, %v169_v41, %v166_v27  ;;  %v2367_v27 = vcombine.high %v478_v24, %v480_v25 }
  0xfb   :  { %v175_v4 = vsel %vm162_vm6, %v174_v44, 0.0 }
  0xfc   :  { %564 = vmatprep.subr.bf16.mxu1 %v2367_v27  ;;  %v2362_v27 = vld [vmem:[%s3157_s2 + $0x1] ss:$0 sm:$0xff] }
 0x160   :  { %v188_v47 = vpop.permute.xlu0 %187 }
 0x161   :  { %v199_v50 = vrot.slane %v188_v47, 7  ;;  %v483_v47 = vld [vmem:[#allocation2 + $0xdc] sm:$0xf] }
 0x162   :  { %v190_v49 = vpop.permute.xlu1 %189 }
 0x163   :  { %v200_v51 = vrot.slane %v190_v49, 7  ;;  %v485_v49 = vld [vmem:[#allocation2 + $0x13c] sm:$0xf] }
 0x165   :  { %v206_v53 = vsel %vm203_vm3, %v199_v50, %v200_v51 }
 0x166   :  { %v213_v54 = vadd.f32 %v206_v53, %v173_v33  ;;  %v482_v33 = vld [vmem:[#allocation2 + $0xd4] sm:$0xff] }
 0x167   :  { %v2370_v37 = vcombine.high %v482_v33, %v484_v34 }
 0x168   :  { %v217_v56 = vadd.f32 %v213_v54, %v96_v29  ;;  %v192_v57 = vpop.permute.xlu1 %191  ;;  %v2366_v29 = vcombine.low %v478_v24, %v480_v25  ;;  %v2363_v25 = vld [vmem:[%s3157_s2 + $0x2] ss:$0 sm:$0xff] }
 0x169   :  { %v201_v58 = vrot.slane %v192_v57, 7  ;;  %v490_v57 = vld [vmem:[#allocation2 + $0x254] sm:$0xff] }
 0x16a   :  { %v194_v59 = vpop.permute.xlu0 %193  ;;  %v228_v12 = vadd.f32 %v2351_v7, %v217_v56 }
 0x16b   :  { %v205_v60 = vsel %vm203_vm3, %v200_v51, %v201_v58  ;;  %v202_v61 = vrot.slane %v194_v59, 7  ;;  %v2371_v51 = vcombine.low %v483_v47, %v485_v49  ;;  %v487_v59 = vld [vmem:[#allocation2 + $0x19c] sm:$0xf] }
 0x16c   :  { %v210_v63 = vsel %vm181_vm5, %v205_v60, 0.0  ;;  %v232_v20 = vmax.f32 %v228_v12, 0.0  ;;  %v721_v12 = vld [vmem:[#allocation2 + $0x28] sm:$0xf] }
 0x16d   :  { %v214_v1 = vadd.f32 %v210_v63, %v177_v62  ;;  %v204_v2 = vsel %vm203_vm3, %v201_v58, %v202_v61  ;;  %v207_v3 = vsel %vm203_vm3, %v202_v61, %v199_v50  ;;  %v2372_v50 = vcombine.low %v486_v45, %v488_v46  ;;  %v492_v58 = vld [vmem:[#allocation2 + $0x2b4] sm:$0xff]  ;;  %v489_v62 = vld [vmem:[#allocation2 + $0x1fc] sm:$0xf] }
 0x16e   :  { %v208_v5 = vsel %vm179_vm7, %v207_v3, 0.0  ;;  %v215_v6 = vadd.f32 %v204_v2, %v171_v43  ;;  %v2376_v61 = vcombine.high %v490_v57, %v492_v58  ;;  %v2375_v3 = vcombine.low %v490_v57, %v492_v58 }
 0x16f   :  { %v218_v8 = vadd.f32 %v214_v1, %v102_v38  ;;  %v212_v9 = vadd.f32 %v208_v5, %v175_v4  ;;  %v481_v38 = vld [vmem:[#allocation2 + $0x7c] sm:$0xf]  ;;  %v2374_v4 = vcombine.low %v487_v59, %v489_v62  ;;  %v724_v62 = vld [vmem:[#allocation2 + $0xe0] sm:$0xff] }
 0x170   :  { %v219_v10 = vadd.f32 %v215_v6, %v106_v42  ;;  %v2369_v42 = vcombine.low %v482_v33, %v484_v34  ;;  %v2368_v43 = vcombine.low %v479_v35, %v481_v38 }
 0x171   :  { %v216_v11 = vadd.f32 %v212_v9, %v2832_v22  ;;  %v229_v13 = vadd.f32 %v2351_v7, %v218_v8  ;;  %v2884_v22 = vpop.f32.mrb[8].mxu0  ;;  %v493_v8 = vld [vmem:[#allocation2 + $0x2bc] sm:$0xf] }
 0x172   :  { %v230_v14 = vadd.f32 %v2351_v7, %v219_v10  ;;  %v2886_v26 = vpop.f32.mrb[9].mxu0  ;;  %2586 = vmatprep.subr.bf16.mxu0 %v2368_v43  ;;  %v2910_v10 = vld [vmem:[#allocation2 + $0x20] sm:$0xff] }
 0x173   :  { %v227_v15 = vadd.f32 %v2351_v7, %v216_v11  ;;  %v233_v16 = vmax.f32 %v229_v13, 0.0  ;;  %v2888_v28 = vpop.f32.mrb[10].mxu0  ;;  %2587 = vmatpush3.bf16.msra.mxu0 %v2368_v43  ;;  %v491_v7 = vld [vmem:[#allocation2 + $0x25c] sm:$0xf]  ;;  %v2912_v11 = vld [vmem:[#allocation2 + $0x80] sm:$0xff] }
 0x174   :  { %v234_v17 = vmax.f32 %v230_v14, 0.0  ;;  %v2890_v31 = vpop.f32.mrb[11].mxu0  ;;  %2588 = vmatprep.subr.bf16.mxu0 %v2371_v51  ;;  %v2377_v9 = vcombine.low %v491_v7, %v493_v8  ;;  %v2383_v13 = vcombine.low %v2910_v10, %v2912_v11  ;;  %v2384_v14 = vcombine.high %v2910_v10, %v2912_v11 }
 0x175   :  { %v231_v19 = vmax.f32 %v227_v15, 0.0  ;;  %v723_v15 = vld [vmem:[#allocation2 + $0x88] sm:$0xf]  ;;  %v457_v35 = vadd.f32 %v2363_v25, %v2890_v31 }
 0x176   :  { %v236_v21 = vpack.c.bf16 %v234_v17, %v233_v16  ;;  %v2918_v16 = vcombine.low %v721_v12, %v723_v15  ;;  %v728_v12 = vld [vmem:[#allocation2 + $0x1a0] sm:$0xff]  ;;  %v729_v15 = vld [vmem:[#allocation2 + $0x1a8] sm:$0xf] }
 0x177   :  { %v235_v23 = vpack.c.bf16 %v232_v20, %v231_v19  ;;  %2589 = vmatpush3.bf16.msra.mxu0 %v2371_v51 }
 0x178   :  { %2590 = vmatprep.subr.bf16.mxu0 %v2374_v4 }
 0x179   :  { %2360 = vmatmul.mubr.msk.bf16.vlgmr.msra.gmra.mrb[0].mxu1 %vm285_vm8, %v235_v23 }
 0x17a   :  { %334 = vmatprep.mubr.bf16.mxu1 %v2772_v0  ;;  %565 = vmatpush1.bf16.msra.mxu1 %v2366_v29 }
 0x17b   :  { %566 = vmatprep.subr.bf16.mxu1 %v2370_v37  ;;  %2591 = vmatpush3.bf16.msra.mxu0 %v2374_v4 }
 0x17c   :  { %2592 = vmatprep.subr.bf16.mxu0 %v2377_v9 }
 0x17e   :  { %567 = vmatpush1.bf16.msra.mxu1 %v2369_v42 }
 0x17f   :  { %568 = vmatprep.subr.bf16.mxu1 %v2373_v48  ;;  %2593 = vmatpush3.bf16.msra.mxu0 %v2377_v9  ;;  %v727_v9 = vld [vmem:[#allocation2 + $0x148] sm:$0xf] }
 0x180   :  { %2598 = vmatprep.subr.bf16.mxu0 %v2918_v16 }
 0x181   :  { %2361 = vmatmul.mubr.msk.bf16.gmra.mrb[4].mxu1 %vm285_vm8, %v236_v21 }
 0x182   :  { %596 = vmatprep.mubr.bf16.mxu1 %v2772_v0  ;;  %569 = vmatpush1.bf16.msra.mxu1 %v2372_v50 }
 0x183   :  { %570 = vmatprep.subr.bf16.mxu1 %v2376_v61 }
 0x186   :  { %571 = vmatpush1.bf16.msra.mxu1 %v2375_v3 }
 0x187   :  { %880 = vmatprep.subr.bf16.mxu1 %v2384_v14 }
 0x24c   :  { %v326_v30 = vpop.f32.mrb[0].mxu1 }
 0x24d   :  { %361 = vrot.lane.b32.xlu0 %v326_v30, %s2773_s0  ;;  %v2893_v32 = vpop.f32.mrb[1].mxu1  ;;  %v345_v39 = vrot.slane %v326_v30, 6 }
 0x24e   :  { %v330_v36 = vpop.f32.mrb[2].mxu1 }
 0x24f   :  { %v346_v40 = vrot.slane %v330_v36, 6  ;;  %v2895_v41 = vpop.f32.mrb[3].mxu1 }
 0x251   :  { %363 = vrot.lane.b32.xlu0 %v330_v36, %s2773_s0  ;;  %v351_v44 = vsel %vm170_vm2, %v345_v39, %v346_v40 }
 0x254   :  { %v336_v53 = vpop.f32.mrb[4].mxu1 }
 0x255   :  { %v347_v54 = vrot.slane %v336_v53, 6  ;;  %v2900_v56 = vpop.f32.mrb[5].mxu1 }
 0x256   :  { %v340_v60 = vpop.f32.mrb[6].mxu1 }
 0x257   :  { %v350_v63 = vsel %vm170_vm2, %v346_v40, %v347_v54  ;;  %v348_v1 = vrot.slane %v340_v60, 6  ;;  %367 = vrot.lane.b32.xlu1 %v340_v60, %s2773_s0  ;;  %v342_v2 = vpop.f32.mrb[7].mxu1  ;;  %v465_v60 = vadd.f32 %v2888_v28, %v2363_v25 }
 0x258   :  { %v355_v46 = vsel %vm164_vm4, %v350_v63, 0.0  ;;  %v726_v63 = vld [vmem:[#allocation2 + $0x140] sm:$0xff] }
 0x259   :  { %v352_v5 = vsel %vm170_vm2, %v348_v1, %v345_v39  ;;  %v349_v6 = vsel %vm170_vm2, %v347_v54, %v348_v1  ;;  %v454_v54 = vadd.f32 %v2363_v25, %v2886_v26  ;;  %v462_v1 = vadd.f32 %v2884_v22, %v2363_v25  ;;  %v735_v25 = vld [vmem:[#allocation2 + $0x2c8] sm:$0xf] }
 0x25a   :  { %v353_v37 = vsel %vm162_vm6, %v352_v5, 0.0  ;;  %v2387_v26 = vcombine.high %v724_v62, %v726_v63  ;;  %v2386_v22 = vcombine.low %v724_v62, %v726_v63  ;;  %v1030_v62 = vld [vmem:[#allocation2 + $0x8c] sm:$0xf] }
 0x25b   :  { %365 = vrot.lane.b32.xlu1 %v336_v53, %s2773_s0 }
 0x2bf   :  { %v362_v17 = vpop.permute.xlu0 %361 }
 0x2c0   :  { %v373_v20 = vrot.slane %v362_v17, 7  ;;  %v731_v17 = vld [vmem:[#allocation2 + $0x208] sm:$0xf] }
 0x2c3   :  { %v364_v19 = vpop.permute.xlu0 %363 }
 0x2c4   :  { %v374_v21 = vrot.slane %v364_v19, 7 }
 0x2c6   :  { %v379_v23 = vsel %vm203_vm3, %v373_v20, %v374_v21 }
 0x2c7   :  { %v386_v24 = vadd.f32 %v379_v23, %v351_v44 }
 0x2c9   :  { %v368_v29 = vpop.permute.xlu1 %367  ;;  %v390_v30 = vadd.f32 %v386_v24, %v2895_v41  ;;  %v733_v24 = vld [vmem:[#allocation2 + $0x268] sm:$0xf] }
 0x2ca   :  { %v376_v33 = vrot.slane %v368_v29, 7  ;;  %v2394_v29 = vcombine.low %v733_v24, %v735_v25 }
 0x2cb   :  { %v401_v34 = vadd.f32 %v2362_v27, %v390_v30  ;;  %v736_v30 = vld [vmem:[#allocation2 + $0x320] sm:$0xff] }
 0x2cc   :  { %v380_v36 = vsel %vm203_vm3, %v376_v33, %v373_v20  ;;  %v2391_v20 = vcombine.low %v729_v15, %v731_v17 }
 0x2cd   :  { %v381_v38 = vsel %vm179_vm7, %v380_v36, 0.0  ;;  %v405_v39 = vmax.f32 %v401_v34, 0.0  ;;  %v366_v40 = vpop.permute.xlu1 %365  ;;  %v739_v36 = vld [vmem:[#allocation2 + $0x388] sm:$0xf] }
 0x2ce   :  { %v385_v42 = vadd.f32 %v381_v38, %v353_v37  ;;  %v375_v43 = vrot.slane %v366_v40, 7  ;;  %v742_v40 = vld [vmem:[#allocation2 + $0x440] sm:$0xff] }
 0x2cf   :  { %v469_v44 = vadd.f32 %v457_v35, %v405_v39  ;;  %v737_v35 = vld [vmem:[#allocation2 + $0x328] sm:$0xf]  ;;  %v740_v39 = vld [vmem:[#allocation2 + $0x3e0] sm:$0xff] }
 0x2d0   :  { %v389_v41 = vadd.f32 %v385_v42, %v2893_v32  ;;  %v377_v45 = vsel %vm203_vm3, %v375_v43, %v376_v33  ;;  %v378_v31 = vsel %vm203_vm3, %v374_v21, %v375_v43  ;;  %v732_v21 = vld [vmem:[#allocation2 + $0x260] sm:$0xff]  ;;  %v2397_v38 = vcombine.low %v737_v35, %v739_v36  ;;  %v741_v43 = vld [vmem:[#allocation2 + $0x3e8] sm:$0xf] }
 0x2d1   :  { %v383_v47 = vsel %vm181_vm5, %v378_v31, 0.0  ;;  %v388_v48 = vadd.f32 %v377_v45, %v349_v6  ;;  %v473_v4 = vmax.f32 %v469_v44, 0.0  ;;  %v738_v33 = vld [vmem:[#allocation2 + $0x380] sm:$0xff]  ;;  %v2399_v42 = vcombine.high %v740_v39, %v742_v40  ;;  %v743_v44 = vld [vmem:[#allocation2 + $0x448] sm:$0xf] }
 0x2d2   :  { %v400_v49 = vadd.f32 %v2362_v27, %v389_v41  ;;  %v387_v50 = vadd.f32 %v383_v47, %v355_v46  ;;  %v2396_v34 = vcombine.high %v736_v30, %v738_v33  ;;  %v2395_v37 = vcombine.low %v736_v30, %v738_v33  ;;  %v744_v31 = vld [vmem:[#allocation2 + $0x4a0] sm:$0xff] }
 0x2d3   :  { %v392_v51 = vadd.f32 %v388_v48, %v342_v2  ;;  %v2398_v41 = vcombine.low %v740_v39, %v742_v40  ;;  %v2400_v45 = vcombine.low %v741_v43, %v743_v44  ;;  %v746_v46 = vld [vmem:[#allocation2 + $0x500] sm:$0xff]  ;;  %v745_v48 = vld [vmem:[#allocation2 + $0x4a8] sm:$0xf]  ;;  %v2382_v44 = vld [vmem:[%s3157_s2 + $0x3] ss:$0 sm:$0xff] }
 0x2d4   :  { %v404_v53 = vmax.f32 %v400_v49, 0.0  ;;  %v391_v32 = vadd.f32 %v387_v50, %v2900_v56  ;;  %v725_v56 = vld [vmem:[#allocation2 + $0xe8] sm:$0xf]  ;;  %v2402_v47 = vcombine.high %v744_v31, %v746_v46  ;;  %v2401_v50 = vcombine.low %v744_v31, %v746_v46 }
 0x2d5   :  { %v403_v57 = vadd.f32 %v2362_v27, %v392_v51  ;;  %v2388_v11 = vcombine.low %v725_v56, %v727_v9  ;;  %v747_v49 = vld [vmem:[#allocation2 + $0x508] sm:$0xf] }
 0x2d6   :  { %v468_v58 = vadd.f32 %v454_v54, %v404_v53  ;;  %v402_v59 = vadd.f32 %v2362_v27, %v391_v32  ;;  %v2403_v51 = vcombine.low %v745_v48, %v747_v49  ;;  %v748_v53 = vld [vmem:[#allocation2 + $0x560] sm:$0xff] }
 0x2d7   :  { %v407_v61 = vmax.f32 %v403_v57, 0.0  ;;  %v750_v54 = vld [vmem:[#allocation2 + $0x5c0] sm:$0xff]  ;;  %v749_v57 = vld [vmem:[#allocation2 + $0x568] sm:$0xf] }
 0x2d8   :  { %v472_v3 = vmax.f32 %v468_v58, 0.0  ;;  %v406_v5 = vmax.f32 %v402_v59, 0.0  ;;  %v2405_v32 = vcombine.high %v748_v53, %v750_v54  ;;  %v751_v58 = vld [vmem:[#allocation2 + $0x5c8] sm:$0xf]  ;;  %v2404_v59 = vcombine.low %v748_v53, %v750_v54 }
 0x2d9   :  { %v471_v6 = vadd.f32 %v465_v60, %v407_v61  ;;  %v2406_v60 = vcombine.low %v749_v57, %v751_v58  ;;  %v1029_v61 = vld [vmem:[#allocation2 + $0x2c] sm:$0xf] }
 0x2da   :  { %v2950_v2 = vpack.c.bf16 %v473_v4, %v472_v3  ;;  %v470_v7 = vadd.f32 %v462_v1, %v406_v5  ;;  %v2965_v63 = vcombine.low %v1029_v61, %v1030_v62  ;;  %v2968_v1 = vld [vmem:[#allocation2 + $0x30] sm:$0xff]  ;;  %v1031_v57 = vld [vmem:[#allocation2 + $0xec] sm:$0xf] }
 0x2db   :  { %v475_v8 = vmax.f32 %v471_v6, 0.0  ;;  %v2970_v3 = vld [vmem:[#allocation2 + $0x90] sm:$0xff]  ;;  %v1032_v58 = vld [vmem:[#allocation2 + $0x14c] sm:$0xf] }
 0x2dc   :  { %v474_v10 = vmax.f32 %v470_v7, 0.0  ;;  %2378 = vmatmul.mubr.msk.bf16.vlgmr.msra.gmra.mrb[8].mxu1 %vm285_vm8, %v2950_v2  ;;  %2594 = vmatprep.mubr.msk.bf16.mxu0 %vm285_vm8, %v2950_v2  ;;  %v2415_v4 = vcombine.low %v2968_v1, %v2970_v3  ;;  %v2416_v5 = vcombine.high %v2968_v1, %v2970_v3  ;;  %v1131_v1 = vld [vmem:[#allocation2 + $0xf0] sm:$0xff] }
 0x2dd   :  { %606 = vmatprep.mubr.bf16.mxu1 %v2772_v0  ;;  %881 = vmatpush1.bf16.msra.mxu1 %v2383_v13  ;;  %v730_v13 = vld [vmem:[#allocation2 + $0x200] sm:$0xff]  ;;  %v1133_v3 = vld [vmem:[#allocation2 + $0x150] sm:$0xff] }
 0x2de   :  { %v2957_v28 = vpack.c.bf16 %v475_v8, %v474_v10  ;;  %882 = vmatprep.subr.bf16.mxu1 %v2387_v26  ;;  %v2390_v14 = vcombine.high %v728_v12, %v730_v13  ;;  %v2389_v19 = vcombine.low %v728_v12, %v730_v13 }
 0x2e0   :  { %2595 = vmatmul.mubr.msk.bf16.vlgmr.msra.gmra.mrb[12].mxu0 %vm285_vm8, %v2957_v28 }
 0x2e1   :  { %2599 = vmatpush3.bf16.msra.mxu0 %v2918_v16  ;;  %883 = vmatpush1.bf16.msra.mxu1 %v2386_v22  ;;  %v734_v16 = vld [vmem:[#allocation2 + $0x2c0] sm:$0xff] }
 0x2e2   :  { %2600 = vmatprep.subr.bf16.mxu0 %v2388_v11  ;;  %884 = vmatprep.subr.bf16.mxu1 %v2390_v14  ;;  %v2393_v23 = vcombine.high %v732_v21, %v734_v16  ;;  %v2392_v27 = vcombine.low %v732_v21, %v734_v16 }
 0x2e4   :  { %2379 = vmatmul.mubr.msk.bf16.gmra.mrb[12].mxu1 %vm285_vm8, %v2957_v28 }
 0x2e5   :  { %2601 = vmatpush3.bf16.msra.mxu0 %v2388_v11  ;;  %912 = vmatprep.mubr.bf16.mxu1 %v2772_v0 }
 0x2e6   :  { %885 = vmatpush1.bf16.msra.mxu1 %v2389_v19  ;;  %2602 = vmatprep.subr.bf16.mxu0 %v2391_v20 }
 0x2e7   :  { %886 = vmatprep.subr.bf16.mxu1 %v2393_v23 }
 0x2e9   :  { %2603 = vmatpush3.bf16.msra.mxu0 %v2391_v20 }
 0x2ea   :  { %887 = vmatpush1.bf16.msra.mxu1 %v2392_v27  ;;  %2604 = vmatprep.subr.bf16.mxu0 %v2394_v29 }
 0x2eb   :  { %888 = vmatprep.subr.bf16.mxu1 %v2396_v34 }
 0x2ed   :  { %2605 = vmatpush3.bf16.msra.mxu0 %v2394_v29 }
 0x2ee   :  { %889 = vmatpush1.bf16.msra.mxu1 %v2395_v37  ;;  %2606 = vmatprep.subr.bf16.mxu0 %v2397_v38 }
 0x2ef   :  { %890 = vmatprep.subr.bf16.mxu1 %v2399_v42 }
 0x2f1   :  { %2607 = vmatpush3.bf16.msra.mxu0 %v2397_v38 }
 0x2f2   :  { %891 = vmatpush1.bf16.msra.mxu1 %v2398_v41  ;;  %2608 = vmatprep.subr.bf16.mxu0 %v2400_v45 }
 0x2f3   :  { %892 = vmatprep.subr.bf16.mxu1 %v2402_v47 }
 0x2f5   :  { %2609 = vmatpush3.bf16.msra.mxu0 %v2400_v45 }
 0x2f6   :  { %893 = vmatpush1.bf16.msra.mxu1 %v2401_v50  ;;  %2610 = vmatprep.subr.bf16.mxu0 %v2403_v51 }
 0x2f7   :  { %894 = vmatprep.subr.bf16.mxu1 %v2405_v32 }
 0x2f9   :  { %2611 = vmatpush3.bf16.msra.mxu0 %v2403_v51 }
 0x2fa   :  { %895 = vmatpush1.bf16.msra.mxu1 %v2404_v59  ;;  %2612 = vmatprep.subr.bf16.mxu0 %v2406_v60 }
 0x2fb   :  { %2618 = vmatprep.subr.bf16.mxu1 %v2965_v63 }
 0x2fd   :  { %2613 = vmatpush3.bf16.msra.mxu0 %v2406_v60 }
 0x2fe   :  { %1287 = vmatprep.subr.bf16.mxu0 %v2416_v5  ;;  %v2410_v5 = vcombine.low %v1031_v57, %v1032_v58  ;;  %v1156_v58 = vld [vmem:[#allocation2 + $0x578] sm:$0xf] }
 0x3af   :  { %v598_v6 = vpop.f32.mrb[8].mxu1 }
 0x3b0   :  { %v600_v7 = vpop.f32.mrb[9].mxu1  ;;  %v670_v8 = vrot.slane %v598_v6, 4  ;;  %v1033_v6 = vld [vmem:[#allocation2 + $0x1ac] sm:$0xf] }
 0x3b1   :  { %v602_v26 = vpop.f32.mrb[10].mxu1  ;;  %v683_v10 = vrot.slane %v600_v7, 6  ;;  %v1034_v7 = vld [vmem:[#allocation2 + $0x20c] sm:$0xf] }
 0x3b2   :  { %v671_v56 = vrot.slane %v602_v26, 4  ;;  %v604_v9 = vpop.f32.mrb[11].mxu1  ;;  %v2411_v26 = vcombine.low %v1033_v6, %v1034_v7  ;;  %v1435_v6 = vld [vmem:[#allocation2 + $0x44] sm:$0xf] }
 0x3b3   :  { %v684_v22 = vrot.slane %v604_v9, 6  ;;  %v2596_v11 = vpop.f32.mrb[12].mxu0 }
 0x3b4   :  { %v651_v12 = vpop.f32.mrb[13].mxu0  ;;  %v677_v13 = vsel %vm674_vm9, %v670_v8, %v671_v56 }
 0x3b5   :  { %v2597_v14 = vpop.f32.mrb[14].mxu0  ;;  %v689_v15 = vsel %vm170_vm2, %v683_v10, %v684_v22 }
 0x3b6   :  { %v654_v17 = vpop.f32.mrb[15].mxu0  ;;  %v696_v19 = vadd.f32 %v689_v15, %v677_v13  ;;  %v2418_v13 = vcombine.low %v1131_v1, %v1133_v3  ;;  %v1135_v15 = vld [vmem:[#allocation2 + $0x1b0] sm:$0xff] }
 0x3b7   :  { %v608_v20 = vpop.f32.mrb[12].mxu1 }
 0x3b8   :  { %v700_v21 = vadd.f32 %v696_v19, %v654_v17  ;;  %v672_v16 = vrot.slane %v608_v20, 4  ;;  %v610_v23 = vpop.f32.mrb[13].mxu1  ;;  %v1136_v19 = vld [vmem:[#allocation2 + $0x1b8] sm:$0xf] }
 0x3b9   :  { %v685_v24 = vrot.slane %v610_v23, 6  ;;  %v612_v25 = vpop.f32.mrb[14].mxu1  ;;  %v1138_v20 = vld [vmem:[#allocation2 + $0x218] sm:$0xf]  ;;  %v1141_v23 = vld [vmem:[#allocation2 + $0x2d0] sm:$0xff] }
 0x3ba   :  { %v676_v27 = vsel %vm674_vm9, %v671_v56, %v672_v16  ;;  %v673_v29 = vrot.slane %v612_v25, 4  ;;  %v614_v30 = vpop.f32.mrb[15].mxu1  ;;  %v711_v48 = vadd.f32 %v2382_v44, %v700_v21  ;;  %v1036_v56 = vld [vmem:[#allocation2 + $0x2cc] sm:$0xf]  ;;  %v1140_v25 = vld [vmem:[#allocation2 + $0x278] sm:$0xf] }
 0x3bb   :  { %v681_v33 = vsel %vm668_vm10, %v676_v27, 0.0  ;;  %v688_v34 = vsel %vm170_vm2, %v684_v22, %v685_v24  ;;  %v686_v35 = vrot.slane %v614_v30, 6  ;;  %v1130_v22 = vld [vmem:[#allocation2 + $0x98] sm:$0xf] }
 0x3bc   :  { %v693_v36 = vsel %vm164_vm4, %v688_v34, 0.0  ;;  %v675_v37 = vsel %vm674_vm9, %v672_v16, %v673_v29  ;;  %v678_v38 = vsel %vm674_vm9, %v673_v29, %v670_v8  ;;  %v715_v59 = vmax.f32 %v711_v48, 0.0  ;;  %v1035_v8 = vld [vmem:[#allocation2 + $0x26c] sm:$0xf]  ;;  %v1142_v27 = vld [vmem:[#allocation2 + $0x2d8] sm:$0xf] }
 0x3bd   :  { %v697_v39 = vadd.f32 %v693_v36, %v681_v33  ;;  %v679_v40 = vsel %vm666_vm11, %v678_v38, 0.0  ;;  %v687_v42 = vsel %vm170_vm2, %v685_v24, %v686_v35  ;;  %v690_v43 = vsel %vm170_vm2, %v686_v35, %v683_v10  ;;  %v1128_v10 = vld [vmem:[#allocation2 + $0x38] sm:$0xf]  ;;  %v1143_v33 = vld [vmem:[#allocation2 + $0x330] sm:$0xff] }
 0x3be   :  { %v691_v41 = vsel %vm162_vm6, %v690_v43, 0.0  ;;  %v698_v45 = vadd.f32 %v687_v42, %v675_v37  ;;  %v2412_v9 = vcombine.low %v1035_v8, %v1036_v56  ;;  %v2423_v16 = vcombine.low %v1136_v19, %v1138_v20  ;;  %v1145_v34 = vld [vmem:[#allocation2 + $0x390] sm:$0xff]  ;;  %v1144_v36 = vld [vmem:[#allocation2 + $0x338] sm:$0xf]  ;;  %v1437_v8 = vld [vmem:[#allocation2 + $0xa4] sm:$0xf] }
 0x3bf   :  { %v701_v31 = vadd.f32 %v2596_v11, %v697_v39  ;;  %v695_v46 = vadd.f32 %v691_v41, %v679_v40  ;;  %v1132_v11 = vld [vmem:[#allocation2 + $0xf8] sm:$0xf]  ;;  %v2426_v30 = vcombine.low %v1140_v25, %v1142_v27  ;;  %v2428_v35 = vcombine.high %v1143_v33, %v1145_v34  ;;  %v1147_v40 = vld [vmem:[#allocation2 + $0x3f0] sm:$0xff] }
 0x3c0   :  { %v702_v47 = vadd.f32 %v2597_v14, %v698_v45  ;;  %v1146_v37 = vld [vmem:[#allocation2 + $0x398] sm:$0xf]  ;;  %v2427_v38 = vcombine.low %v1143_v33, %v1145_v34  ;;  %v1149_v42 = vld [vmem:[#allocation2 + $0x450] sm:$0xff]  ;;  %v3024_v56 = vcombine.low %v1435_v6, %v1437_v8 }
 0x3c1   :  { %v699_v49 = vadd.f32 %v695_v46, %v651_v12  ;;  %v712_v50 = vadd.f32 %v2382_v44, %v701_v31  ;;  %v1134_v12 = vld [vmem:[#allocation2 + $0x158] sm:$0xf]  ;;  %v2429_v39 = vcombine.low %v1144_v36, %v1146_v37  ;;  %v2431_v43 = vcombine.high %v1147_v40, %v1149_v42  ;;  %v1151_v46 = vld [vmem:[#allocation2 + $0x4b0] sm:$0xff] }
 0x3c2   :  { %v713_v51 = vadd.f32 %v2382_v44, %v702_v47  ;;  %v2420_v14 = vcombine.low %v1132_v11, %v1134_v12  ;;  %v1150_v41 = vld [vmem:[#allocation2 + $0x458] sm:$0xf]  ;;  %v2430_v45 = vcombine.low %v1147_v40, %v1149_v42  ;;  %v1153_v47 = vld [vmem:[#allocation2 + $0x510] sm:$0xff] }
 0x3c3   :  { %v710_v53 = vadd.f32 %v2382_v44, %v699_v49  ;;  %v716_v54 = vmax.f32 %v712_v50, 0.0  ;;  %v1148_v44 = vld [vmem:[#allocation2 + $0x3f8] sm:$0xf]  ;;  %v2434_v48 = vcombine.high %v1151_v46, %v1153_v47 }
 0x3c4   :  { %v717_v32 = vmax.f32 %v713_v51, 0.0  ;;  %v2432_v31 = vcombine.low %v1148_v44, %v1150_v41  ;;  %v1152_v49 = vld [vmem:[#allocation2 + $0x4b8] sm:$0xf]  ;;  %v2433_v51 = vcombine.low %v1151_v46, %v1153_v47 }
 0x3c5   :  { %v714_v60 = vmax.f32 %v710_v53, 0.0  ;;  %v1154_v50 = vld [vmem:[#allocation2 + $0x518] sm:$0xf] }
 0x3c6   :  { %v719_v61 = vpack.c.bf16 %v717_v32, %v716_v54  ;;  %v2435_v53 = vcombine.low %v1152_v49, %v1154_v50  ;;  %v1155_v54 = vld [vmem:[#allocation2 + $0x570] sm:$0xff] }
 0x3c7   :  { %v718_v62 = vpack.c.bf16 %v715_v59, %v714_v60  ;;  %v1157_v32 = vld [vmem:[#allocation2 + $0x5d0] sm:$0xff]  ;;  %v1158_v59 = vld [vmem:[#allocation2 + $0x5d8] sm:$0xf] }
 0x3c8   :  { %v2437_v57 = vcombine.high %v1155_v54, %v1157_v32  ;;  %v2436_v60 = vcombine.low %v1155_v54, %v1157_v32 }
 0x3c9   :  { %913 = vmatmul.mubr.bf16.vlgmr.msra.gmra.mrb[16].mxu1 %v718_v62  ;;  %2614 = vmatprep.mubr.bf16.mxu0 %v718_v62  ;;  %v3016_v62 = vld [vmem:[#allocation2 + $0x3c] sm:$0xff] }
 0x3ca   :  { %2615 = vmatmul.mubr.bf16.vlgmr.msra.gmra.mrb[16].mxu0 %v719_v61  ;;  %2619 = vmatpush3.bf16.msra.mxu1 %v2965_v63  ;;  %v2417_v63 = vcombine.low %v1128_v10, %v1130_v22 }
 0x3cb   :  { %2620 = vmatprep.subr.bf16.mxu1 %v2410_v5  ;;  %922 = vmatprep.mubr.bf16.mxu1 %v2772_v0 }
 0x3cc   :  { %1288 = vmatpush1.bf16.msra.mxu0 %v2415_v4  ;;  %1319 = vmatprep.mubr.bf16.mxu0 %v2772_v0  ;;  %v2419_v4 = vcombine.high %v1131_v1, %v1133_v3 }
 0x3ce   :  { %2621 = vmatpush3.bf16.msra.mxu1 %v2410_v5  ;;  %1289 = vmatprep.subr.bf16.mxu0 %v2419_v4  ;;  %v3018_v5 = vld [vmem:[#allocation2 + $0x9c] sm:$0xff] }
 0x3cf   :  { %2622 = vmatprep.subr.bf16.mxu1 %v2411_v26  ;;  %v2440_v7 = vcombine.low %v3016_v62, %v3018_v5 }
 0x3d0   :  { %1290 = vmatpush1.bf16.msra.mxu0 %v2418_v13 }
 0x3d1   :  { %923 = vmatmul.mubr.bf16.gmra.mrb[20].mxu1 %v719_v61  ;;  %v2438_v61 = vcombine.low %v1156_v58, %v1158_v59 }
 0x3d2   :  { %2623 = vmatpush3.bf16.msra.mxu1 %v2411_v26  ;;  %2626 = vmatprep.mubr.msk.bf16.mxu1 %vm285_vm8, %v2950_v2  ;;  %v1137_v2 = vld [vmem:[#allocation2 + $0x210] sm:$0xff]  ;;  %v2441_v26 = vcombine.high %v3016_v62, %v3018_v5  ;;  %v1446_v62 = vld [vmem:[#allocation2 + $0x27c] sm:$0xff] }
 0x3d3   :  { %2624 = vmatprep.subr.bf16.mxu1 %v2412_v9  ;;  %v2422_v17 = vcombine.high %v1135_v15, %v1137_v2  ;;  %v2421_v21 = vcombine.low %v1135_v15, %v1137_v2  ;;  %v1448_v5 = vld [vmem:[#allocation2 + $0x2dc] sm:$0xff] }
 0x3d5   :  { %1291 = vmatprep.subr.bf16.mxu0 %v2422_v17 }
 0x3d6   :  { %2625 = vmatpush3.bf16.msra.mxu1 %v2412_v9  ;;  %1292 = vmatpush1.bf16.msra.mxu0 %v2421_v21 }
 0x3d7   :  { %2630 = vmatprep.subr.bf16.mxu1 %v2417_v63 }
 0x3d9   :  { %2627 = vmatmul.mubr.msk.bf16.vlgmr.msra.gmra.mrb[24].mxu1 %vm285_vm8, %v2957_v28  ;;  %v1139_v28 = vld [vmem:[#allocation2 + $0x270] sm:$0xff] }
 0x3da   :  { %2631 = vmatpush3.bf16.msra.mxu1 %v2417_v63  ;;  %v2425_v24 = vcombine.high %v1139_v28, %v1141_v23  ;;  %v2424_v29 = vcombine.low %v1139_v28, %v1141_v23 }
 0x3db   :  { %2632 = vmatprep.subr.bf16.mxu1 %v2420_v14 }
 0x3dc   :  { %1293 = vmatprep.subr.bf16.mxu0 %v2425_v24 }
 0x3dd   :  { %1294 = vmatpush1.bf16.msra.mxu0 %v2424_v29 }
 0x3de   :  { %2633 = vmatpush3.bf16.msra.mxu1 %v2420_v14  ;;  %1295 = vmatprep.subr.bf16.mxu0 %v2428_v35 }
 0x3df   :  { %2634 = vmatprep.subr.bf16.mxu1 %v2423_v16 }
 0x3e1   :  { %1296 = vmatpush1.bf16.msra.mxu0 %v2427_v38 }
 0x3e2   :  { %2635 = vmatpush3.bf16.msra.mxu1 %v2423_v16  ;;  %1297 = vmatprep.subr.bf16.mxu0 %v2431_v43 }
 0x3e3   :  { %2636 = vmatprep.subr.bf16.mxu1 %v2426_v30 }
 0x3e5   :  { %1298 = vmatpush1.bf16.msra.mxu0 %v2430_v45 }
 0x3e6   :  { %2637 = vmatpush3.bf16.msra.mxu1 %v2426_v30  ;;  %1299 = vmatprep.subr.bf16.mxu0 %v2434_v48  ;;  %v2407_v30 = vld [vmem:[%s3157_s2 + $0x4] ss:$0 sm:$0xff]  ;;  %v2408_v48 = vld [vmem:[%s3157_s2 + $0x5] ss:$0 sm:$0xff] }
 0x3e7   :  { %2638 = vmatprep.subr.bf16.mxu1 %v2429_v39 }
 0x3e9   :  { %1300 = vmatpush1.bf16.msra.mxu0 %v2433_v51 }
 0x3ea   :  { %2639 = vmatpush3.bf16.msra.mxu1 %v2429_v39  ;;  %1301 = vmatprep.subr.bf16.mxu0 %v2437_v57 }
 0x3eb   :  { %2640 = vmatprep.subr.bf16.mxu1 %v2432_v31 }
 0x3ed   :  { %1302 = vmatpush1.bf16.msra.mxu0 %v2436_v60 }
 0x3ee   :  { %2641 = vmatpush3.bf16.msra.mxu1 %v2432_v31  ;;  %1594 = vmatprep.subr.bf16.mxu0 %v2441_v26 }
 0x3ef   :  { %2642 = vmatprep.subr.bf16.mxu1 %v2435_v53 }
 0x3f2   :  { %2643 = vmatpush3.bf16.msra.mxu1 %v2435_v53 }
 0x3f3   :  { %2644 = vmatprep.subr.bf16.mxu1 %v2438_v61 }
 0x3f6   :  { %2645 = vmatpush3.bf16.msra.mxu1 %v2438_v61 }
 0x3f7   :  { %2650 = vmatprep.subr.bf16.mxu1 %v3024_v56 }
 0x49c   :  { %v914_v9 = vpop.f32.mrb[16].mxu1 }
 0x49d   :  { %v916_v10 = vpop.f32.mrb[17].mxu1  ;;  %v2616_v22 = vpop.f32.mrb[16].mxu0  ;;  %v982_v3 = vrot.slane %v914_v9, 4 }
 0x49e   :  { %v918_v63 = vpop.f32.mrb[18].mxu1  ;;  %v967_v1 = vpop.f32.mrb[17].mxu0  ;;  %v994_v13 = vrot.slane %v916_v10, 6 }
 0x49f   :  { %v983_v4 = vrot.slane %v918_v63, 4  ;;  %v920_v11 = vpop.f32.mrb[19].mxu1  ;;  %v2617_v12 = vpop.f32.mrb[18].mxu0 }
 0x4a0   :  { %v995_v14 = vrot.slane %v920_v11, 6  ;;  %v970_v15 = vpop.f32.mrb[19].mxu0 }
 0x4a1   :  { %v988_v2 = vsel %vm674_vm9, %v982_v3, %v983_v4 }
 0x4a2   :  { %v1000_v17 = vsel %vm170_vm2, %v994_v13, %v995_v14 }
 0x4a3   :  { %v1007_v19 = vadd.f32 %v1000_v17, %v988_v2  ;;  %v1439_v2 = vld [vmem:[#allocation2 + $0x104] sm:$0xf] }
 0x4a4   :  { %v924_v20 = vpop.f32.mrb[20].mxu1  ;;  %v1441_v17 = vld [vmem:[#allocation2 + $0x164] sm:$0xf] }
 0x4a5   :  { %v1011_v21 = vadd.f32 %v1007_v19, %v970_v15  ;;  %v984_v16 = vrot.slane %v924_v20, 4  ;;  %v926_v28 = vpop.f32.mrb[21].mxu1 }
 0x4a6   :  { %v996_v23 = vrot.slane %v926_v28, 6  ;;  %v928_v24 = vpop.f32.mrb[22].mxu1 }
 0x4a7   :  { %v987_v25 = vsel %vm674_vm9, %v983_v4, %v984_v16  ;;  %v985_v27 = vrot.slane %v928_v24, 4  ;;  %v930_v29 = vpop.f32.mrb[23].mxu1  ;;  %v1022_v44 = vadd.f32 %v2407_v30, %v1011_v21  ;;  %v1444_v24 = vld [vmem:[#allocation2 + $0x21c] sm:$0xff] }
 0x4a8   :  { %v992_v33 = vsel %vm668_vm10, %v987_v25, 0.0  ;;  %v999_v34 = vsel %vm170_vm2, %v995_v14, %v996_v23  ;;  %v997_v35 = vrot.slane %v930_v29, 6  ;;  %v1445_v29 = vld [vmem:[#allocation2 + $0x224] sm:$0xf] }
 0x4a9   :  { %v1004_v36 = vsel %vm164_vm4, %v999_v34, 0.0  ;;  %v986_v37 = vsel %vm674_vm9, %v984_v16, %v985_v27  ;;  %v989_v38 = vsel %vm674_vm9, %v985_v27, %v982_v3  ;;  %v1026_v32 = vmax.f32 %v1022_v44, 0.0  ;;  %v1443_v27 = vld [vmem:[#allocation2 + $0x1c4] sm:$0xf] }
 0x4aa   :  { %v1008_v39 = vadd.f32 %v1004_v36, %v992_v33  ;;  %v990_v40 = vsel %vm666_vm11, %v989_v38, 0.0  ;;  %v998_v42 = vsel %vm170_vm2, %v996_v23, %v997_v35  ;;  %v1001_v43 = vsel %vm170_vm2, %v997_v35, %v994_v13  ;;  %v1438_v13 = vld [vmem:[#allocation2 + $0xfc] sm:$0xff]  ;;  %v1449_v34 = vld [vmem:[#allocation2 + $0x2e4] sm:$0xf] }
 0x4ab   :  { %v1002_v41 = vsel %vm162_vm6, %v1001_v43, 0.0  ;;  %v1009_v45 = vadd.f32 %v998_v42, %v986_v37  ;;  %v2445_v16 = vcombine.low %v1439_v2, %v1441_v17  ;;  %v1442_v23 = vld [vmem:[#allocation2 + $0x1bc] sm:$0xff]  ;;  %v2448_v33 = vcombine.low %v1443_v27, %v1445_v29  ;;  %v1453_v42 = vld [vmem:[#allocation2 + $0x3a4] sm:$0xf] }
 0x4ac   :  { %v1006_v31 = vadd.f32 %v1002_v41, %v990_v40  ;;  %v1012_v46 = vadd.f32 %v2616_v22, %v1008_v39  ;;  %v2628_v47 = vpop.f32.mrb[24].mxu1  ;;  %v2447_v25 = vcombine.high %v1442_v23, %v1444_v24  ;;  %v2449_v35 = vcombine.low %v1446_v62, %v1448_v5  ;;  %v1450_v37 = vld [vmem:[#allocation2 + $0x33c] sm:$0xff]  ;;  %v1451_v40 = vld [vmem:[#allocation2 + $0x344] sm:$0xf] }
 0x4ad   :  { %v1102_v49 = vpop.f32.mrb[25].mxu1  ;;  %v1013_v50 = vadd.f32 %v2617_v12, %v1009_v45  ;;  %v1111_v60 = vadd.f32 %v2628_v47, %v2408_v48  ;;  %v1452_v38 = vld [vmem:[#allocation2 + $0x39c] sm:$0xff]  ;;  %v2454_v44 = vcombine.low %v1451_v40, %v1453_v42  ;;  %v1457_v47 = vld [vmem:[#allocation2 + $0x464] sm:$0xf] }
 0x4ae   :  { %v1023_v51 = vadd.f32 %v2407_v30, %v1012_v46  ;;  %v1010_v53 = vadd.f32 %v1006_v31, %v967_v1  ;;  %v2629_v54 = vpop.f32.mrb[26].mxu1  ;;  %v1103_v22 = vadd.f32 %v2408_v48, %v1102_v49  ;;  %v1440_v1 = vld [vmem:[#allocation2 + $0x15c] sm:$0xff]  ;;  %v2453_v39 = vcombine.high %v1450_v37, %v1452_v38  ;;  %v1455_v46 = vld [vmem:[#allocation2 + $0x404] sm:$0xf] }
 0x4af   :  { %v1024_v57 = vadd.f32 %v2407_v30, %v1013_v50  ;;  %v1105_v58 = vpop.f32.mrb[27].mxu1  ;;  %v1114_v8 = vadd.f32 %v2629_v54, %v2408_v48  ;;  %v2444_v21 = vcombine.high %v1438_v13, %v1440_v1  ;;  %v2443_v28 = vcombine.low %v1438_v13, %v1440_v1  ;;  %v1454_v41 = vld [vmem:[#allocation2 + $0x3fc] sm:$0xff]  ;;  %v1459_v54 = vld [vmem:[#allocation2 + $0x4c4] sm:$0xf] }
 0x4b0   :  { %v1027_v59 = vmax.f32 %v1023_v51, 0.0  ;;  %v1021_v61 = vadd.f32 %v2407_v30, %v1010_v53  ;;  %v1106_v6 = vadd.f32 %v2408_v48, %v1105_v58  ;;  %v2446_v30 = vcombine.low %v1442_v23, %v1444_v24  ;;  %v1456_v45 = vld [vmem:[#allocation2 + $0x45c] sm:$0xff] }
 0x4b1   :  { %v1028_v26 = vmax.f32 %v1024_v57, 0.0  ;;  %v2452_v43 = vcombine.low %v1450_v37, %v1452_v38  ;;  %v2456_v31 = vcombine.high %v1454_v41, %v1456_v45  ;;  %v2455_v48 = vcombine.low %v1454_v41, %v1456_v45  ;;  %v1458_v50 = vld [vmem:[#allocation2 + $0x4bc] sm:$0xff] }
 0x4b2   :  { %v1119_v9 = vadd.f32 %v1111_v60, %v1027_v59  ;;  %v1025_v10 = vmax.f32 %v1021_v61, 0.0  ;;  %v1118_v63 = vadd.f32 %v1106_v6, %v1026_v32  ;;  %v2457_v49 = vcombine.low %v1455_v46, %v1457_v47  ;;  %v1460_v51 = vld [vmem:[#allocation2 + $0x51c] sm:$0xff]  ;;  %v1461_v32 = vld [vmem:[#allocation2 + $0x524] sm:$0xf] }
 0x4b3   :  { %v1120_v3 = vadd.f32 %v1114_v8, %v1028_v26  ;;  %v2459_v53 = vcombine.high %v1458_v50, %v1460_v51  ;;  %v2458_v57 = vcombine.low %v1458_v50, %v1460_v51  ;;  %v2460_v58 = vcombine.low %v1459_v54, %v1461_v32  ;;  %v1462_v59 = vld [vmem:[#allocation2 + $0x57c] sm:$0xff]  ;;  %v1463_v6 = vld [vmem:[#allocation2 + $0x584] sm:$0xf]  ;;  %v1755_v54 = vld [vmem:[#allocation2 + $0x168] sm:$0xff] }
 0x4b4   :  { %v1123_v4 = vmax.f32 %v1119_v9, 0.0  ;;  %v1117_v11 = vadd.f32 %v1103_v22, %v1025_v10  ;;  %v1122_v15 = vmax.f32 %v1118_v63, 0.0  ;;  %v1464_v60 = vld [vmem:[#allocation2 + $0x5dc] sm:$0xff]  ;;  %v1465_v26 = vld [vmem:[#allocation2 + $0x5e4] sm:$0xf]  ;;  %v1749_v10 = vld [vmem:[#allocation2 + $0x48] sm:$0xff] }
 0x4b5   :  { %v1124_v12 = vmax.f32 %v1120_v3, 0.0  ;;  %v2462_v61 = vcombine.high %v1462_v59, %v1464_v60  ;;  %v2461_v8 = vcombine.low %v1462_v59, %v1464_v60  ;;  %v2463_v9 = vcombine.low %v1463_v6, %v1465_v26  ;;  %v1751_v22 = vld [vmem:[#allocation2 + $0xa8] sm:$0xff]  ;;  %v1750_v63 = vld [vmem:[#allocation2 + $0x50] sm:$0xf] }
 0x4b6   :  { %v1121_v14 = vmax.f32 %v1117_v11, 0.0  ;;  %v2465_v3 = vcombine.low %v1749_v10, %v1751_v22  ;;  %v1752_v11 = vld [vmem:[#allocation2 + $0xb0] sm:$0xf]  ;;  %v1759_v6 = vld [vmem:[#allocation2 + $0x228] sm:$0xff] }
 0x4b7   :  { %v3057_v19 = vpack.c.bf16 %v1124_v12, %v1123_v4  ;;  %v2466_v4 = vcombine.high %v1749_v10, %v1751_v22  ;;  %v2467_v12 = vcombine.low %v1750_v63, %v1752_v11  ;;  %v1761_v63 = vld [vmem:[#allocation2 + $0x288] sm:$0xff]  ;;  %v1762_v11 = vld [vmem:[#allocation2 + $0x290] sm:$0xf] }
 0x4b8   :  { %v3059_v20 = vpack.c.bf16 %v1122_v15, %v1121_v14 }
 0x4b9   :  { %v1737_v52 = vunpack.c.l.bf16 %v3057_v19  ;;  %v1738_v18 = vunpack.c.h.bf16 %v3057_v19 }
 0x4ba   :  { %1320 = vmatmul.mubr.bf16.vlgmr.msra.gmra.mrb[20].mxu0 %v3059_v20  ;;  %2646 = vmatprep.mubr.bf16.mxu1 %v3059_v20 }
 0x4bb   :  { %2647 = vmatmul.mubr.bf16.vlgmr.msra.gmra.mrb[28].mxu1 %v3057_v19  ;;  %1329 = vmatprep.mubr.bf16.mxu0 %v2772_v0 }
 0x4bc   :  { %1595 = vmatpush1.bf16.msra.mxu0 %v2440_v7  ;;  %2651 = vmatpush3.bf16.msra.mxu1 %v3024_v56  ;;  %v2450_v7 = vcombine.high %v1446_v62, %v1448_v5  ;;  %v1447_v56 = vld [vmem:[#allocation2 + $0x284] sm:$0xf] }
 0x4bd   :  { %1596 = vmatprep.subr.bf16.mxu0 %v2444_v21  ;;  %2652 = vmatprep.subr.bf16.mxu1 %v2445_v16  ;;  %v2451_v36 = vcombine.low %v1447_v56, %v1449_v34  ;;  %v2439_v34 = vld [vmem:[%s3157_s2 + $0x6] ss:$0 sm:$0xff] }
 0x4c0   :  { %1597 = vmatpush1.bf16.msra.mxu0 %v2443_v28  ;;  %2653 = vmatpush3.bf16.msra.mxu1 %v2445_v16 }
 0x4c1   :  { %1598 = vmatprep.subr.bf16.mxu0 %v2447_v25  ;;  %2654 = vmatprep.subr.bf16.mxu1 %v2448_v33 }
 0x4c2   :  { %1330 = vmatmul.mubr.bf16.gmra.mrb[24].mxu0 %v3057_v19  ;;  %v2042_v19 = vld [vmem:[#allocation2 + $0x234] sm:$0xff] }
 0x4c3   :  { %1626 = vmatprep.mubr.bf16.mxu0 %v2772_v0 }
 0x4c4   :  { %1599 = vmatpush1.bf16.msra.mxu0 %v2446_v30  ;;  %2655 = vmatpush3.bf16.msra.mxu1 %v2448_v33 }
 0x4c5   :  { %1600 = vmatprep.subr.bf16.mxu0 %v2450_v7  ;;  %2656 = vmatprep.subr.bf16.mxu1 %v2451_v36 }
 0x4c8   :  { %1601 = vmatpush1.bf16.msra.mxu0 %v2449_v35  ;;  %2657 = vmatpush3.bf16.msra.mxu1 %v2451_v36 }
 0x4c9   :  { %1602 = vmatprep.subr.bf16.mxu0 %v2453_v39  ;;  %2658 = vmatprep.subr.bf16.mxu1 %v2454_v44 }
 0x4cc   :  { %1603 = vmatpush1.bf16.msra.mxu0 %v2452_v43  ;;  %2659 = vmatpush3.bf16.msra.mxu1 %v2454_v44 }
 0x4cd   :  { %1604 = vmatprep.subr.bf16.mxu0 %v2456_v31  ;;  %2660 = vmatprep.subr.bf16.mxu1 %v2457_v49 }
 0x4d0   :  { %1605 = vmatpush1.bf16.msra.mxu0 %v2455_v48  ;;  %2661 = vmatpush3.bf16.msra.mxu1 %v2457_v49 }
 0x4d1   :  { %1606 = vmatprep.subr.bf16.mxu0 %v2459_v53  ;;  %2662 = vmatprep.subr.bf16.mxu1 %v2460_v58  ;;  %v1753_v53 = vld [vmem:[#allocation2 + $0x108] sm:$0xff] }
 0x4d2   :  { %v2469_v32 = vcombine.high %v1753_v53, %v1755_v54  ;;  %v2468_v59 = vcombine.low %v1753_v53, %v1755_v54 }
 0x4d4   :  { %1607 = vmatpush1.bf16.msra.mxu0 %v2458_v57  ;;  %2663 = vmatpush3.bf16.msra.mxu1 %v2460_v58  ;;  %v1754_v57 = vld [vmem:[#allocation2 + $0x110] sm:$0xf] }
 0x4d5   :  { %1608 = vmatprep.subr.bf16.mxu0 %v2462_v61  ;;  %2664 = vmatprep.subr.bf16.mxu1 %v2463_v9  ;;  %v1756_v58 = vld [vmem:[#allocation2 + $0x170] sm:$0xf]  ;;  %v1757_v61 = vld [vmem:[#allocation2 + $0x1c8] sm:$0xff] }
 0x4d6   :  { %v2470_v60 = vcombine.low %v1754_v57, %v1756_v58  ;;  %v2472_v26 = vcombine.high %v1757_v61, %v1759_v6  ;;  %v2471_v10 = vcombine.low %v1757_v61, %v1759_v6 }
 0x4d8   :  { %1609 = vmatpush1.bf16.msra.mxu0 %v2461_v8  ;;  %2665 = vmatpush3.bf16.msra.mxu1 %v2463_v9  ;;  %v1758_v8 = vld [vmem:[#allocation2 + $0x1d0] sm:$0xf] }
 0x4d9   :  { %1909 = vmatprep.subr.bf16.mxu0 %v2466_v4  ;;  %2670 = vmatprep.subr.bf16.mxu1 %v2467_v12  ;;  %v1760_v9 = vld [vmem:[#allocation2 + $0x230] sm:$0xf] }
 0x4da   :  { %v2473_v22 = vcombine.low %v1758_v8, %v1760_v9  ;;  %v2464_v8 = vld [vmem:[%s3157_s2 + $0x7] ss:$0 sm:$0xff] }
 0x58d   :  { %v1321_v13 = vpop.f32.mrb[20].mxu0 }
 0x58e   :  { %v1323_v1 = vpop.f32.mrb[21].mxu0  ;;  %v2648_v14 = vpop.f32.mrb[28].mxu1 }
 0x58f   :  { %v1325_v15 = vpop.f32.mrb[22].mxu0  ;;  %v1374_v2 = vpop.f32.mrb[29].mxu1  ;;  %v1397_v16 = vrot.slane %v1323_v1, 4 }
 0x590   :  { %v1327_v17 = vpop.f32.mrb[23].mxu0  ;;  %v2649_v21 = vpop.f32.mrb[30].mxu1  ;;  %v1767_v15 = vld [vmem:[#allocation2 + $0x3a8] sm:$0xff] }
 0x591   :  { %v1398_v28 = vrot.slane %v1327_v17, 4  ;;  %v1377_v23 = vpop.f32.mrb[31].mxu1  ;;  %v1766_v17 = vld [vmem:[#allocation2 + $0x350] sm:$0xf] }
 0x593   :  { %v1403_v24 = vsel %vm674_vm9, %v1397_v16, %v1398_v28 }
 0x594   :  { %v1410_v25 = vadd.f32 %v1403_v24, %v1321_v13  ;;  %v1771_v24 = vld [vmem:[#allocation2 + $0x468] sm:$0xff] }
 0x595   :  { %v1331_v27 = vpop.f32.mrb[24].mxu0 }
 0x596   :  { %v1414_v29 = vadd.f32 %v1410_v25, %v1377_v23  ;;  %v1333_v30 = vpop.f32.mrb[25].mxu0  ;;  %v1769_v23 = vld [vmem:[#allocation2 + $0x408] sm:$0xff] }
 0x597   :  { %v1399_v33 = vrot.slane %v1333_v30, 4  ;;  %v1335_v62 = vpop.f32.mrb[26].mxu0  ;;  %v2481_v25 = vcombine.high %v1769_v23, %v1771_v24  ;;  %v2480_v30 = vcombine.low %v1769_v23, %v1771_v24 }
 0x598   :  { %v1337_v5 = vpop.f32.mrb[27].mxu0  ;;  %v1425_v42 = vadd.f32 %v2439_v34, %v1414_v29  ;;  %v1772_v29 = vld [vmem:[#allocation2 + $0x470] sm:$0xf]  ;;  %v1773_v62 = vld [vmem:[#allocation2 + $0x4c8] sm:$0xff] }
 0x599   :  { %v1402_v7 = vsel %vm674_vm9, %v1398_v28, %v1399_v33  ;;  %v1400_v56 = vrot.slane %v1337_v5, 4  ;;  %v1775_v5 = vld [vmem:[#allocation2 + $0x528] sm:$0xff] }
 0x59a   :  { %v1407_v35 = vsel %vm668_vm10, %v1402_v7, 0.0  ;;  %v1429_v46 = vmax.f32 %v1425_v42, 0.0  ;;  %v2484_v7 = vcombine.high %v1773_v62, %v1775_v5  ;;  %v1780_v42 = vld [vmem:[#allocation2 + $0x5f0] sm:$0xf] }
 0x59b   :  { %v1415_v36 = vadd.f32 %v2648_v14, %v1407_v35  ;;  %v1401_v37 = vsel %vm674_vm9, %v1399_v33, %v1400_v56  ;;  %v1404_v38 = vsel %vm674_vm9, %v1400_v56, %v1397_v16  ;;  %v1765_v14 = vld [vmem:[#allocation2 + $0x348] sm:$0xff]  ;;  %v1774_v56 = vld [vmem:[#allocation2 + $0x4d0] sm:$0xf]  ;;  %v2483_v35 = vcombine.low %v1773_v62, %v1775_v5 }
 0x59c   :  { %v1405_v39 = vsel %vm666_vm11, %v1404_v38, 0.0  ;;  %v1412_v40 = vadd.f32 %v1401_v37, %v1331_v27  ;;  %v2477_v16 = vcombine.low %v1765_v14, %v1767_v15  ;;  %v1770_v27 = vld [vmem:[#allocation2 + $0x410] sm:$0xf]  ;;  %v1777_v37 = vld [vmem:[#allocation2 + $0x588] sm:$0xff]  ;;  %v1735_v62 = vunpack.c.l.bf16 %v3059_v20 }
 0x59d   :  { %v1413_v43 = vadd.f32 %v1405_v39, %v1374_v2  ;;  %v1426_v44 = vadd.f32 %v2439_v34, %v1415_v36  ;;  %v2478_v2 = vcombine.high %v1765_v14, %v1767_v15  ;;  %v2482_v33 = vcombine.low %v1770_v27, %v1772_v29  ;;  %v1779_v38 = vld [vmem:[#allocation2 + $0x5e8] sm:$0xff] }
 0x59e   :  { %v1416_v41 = vadd.f32 %v2649_v21, %v1412_v40  ;;  %v1768_v21 = vld [vmem:[#allocation2 + $0x3b0] sm:$0xf]  ;;  %v2487_v39 = vcombine.high %v1777_v37, %v1779_v38  ;;  %v1736_v14 = vunpack.c.h.bf16 %v3059_v20 }
 0x59f   :  { %v1424_v45 = vadd.f32 %v2439_v34, %v1413_v43  ;;  %v1430_v48 = vmax.f32 %v1426_v44, 0.0  ;;  %v2479_v28 = vcombine.low %v1766_v17, %v1768_v21  ;;  %v1778_v40 = vld [vmem:[#allocation2 + $0x590] sm:$0xf]  ;;  %v2486_v43 = vcombine.low %v1777_v37, %v1779_v38 }
 0x5a0   :  { %v1427_v31 = vadd.f32 %v2439_v34, %v1416_v41  ;;  %v1776_v34 = vld [vmem:[#allocation2 + $0x530] sm:$0xf]  ;;  %v2488_v44 = vcombine.low %v1778_v40, %v1780_v42  ;;  %v3088_v41 = vld [vmem:[#allocation2 + $0x54] sm:$0xff]  ;;  %v2039_v40 = vld [vmem:[#allocation2 + $0x17c] sm:$0xf] }
 0x5a1   :  { %v1428_v47 = vmax.f32 %v1424_v45, 0.0  ;;  %v2485_v36 = vcombine.low %v1774_v56, %v1776_v34  ;;  %v3090_v45 = vld [vmem:[#allocation2 + $0xb4] sm:$0xff] }
 0x5a2   :  { %v1431_v49 = vmax.f32 %v1427_v31, 0.0  ;;  %v2490_v31 = vcombine.low %v3088_v41, %v3090_v45 }
 0x5a3   :  { %v1432_v50 = vpack.c.bf16 %v1429_v46, %v1428_v47  ;;  %v2491_v46 = vcombine.high %v3088_v41, %v3090_v45  ;;  %v2033_v47 = vld [vmem:[#allocation2 + $0x5c] sm:$0xf]  ;;  %v2048_v41 = vld [vmem:[#allocation2 + $0x354] sm:$0xff] }
 0x5a4   :  { %v1433_v51 = vpack.c.bf16 %v1431_v49, %v1430_v48  ;;  %v2035_v48 = vld [vmem:[#allocation2 + $0xbc] sm:$0xf]  ;;  %v2050_v45 = vld [vmem:[#allocation2 + $0x3b4] sm:$0xff] }
 0x5a5   :  { %1627 = vmatmul.mubr.bf16.vlgmr.msra.gmra.mrb[28].mxu0 %v1432_v50  ;;  %2666 = vmatprep.mubr.bf16.mxu1 %v1432_v50  ;;  %v3096_v49 = vcombine.low %v2033_v47, %v2035_v48  ;;  %v2040_v47 = vld [vmem:[#allocation2 + $0x1d4] sm:$0xff] }
 0x5a6   :  { %2667 = vmatmul.mubr.bf16.vlgmr.msra.gmra.mrb[32].mxu1 %v1433_v51  ;;  %1636 = vmatprep.mubr.bf16.mxu0 %v2772_v0 }
 0x5a7   :  { %1910 = vmatpush1.bf16.msra.mxu0 %v2465_v3  ;;  %2671 = vmatpush3.bf16.msra.mxu1 %v2467_v12  ;;  %v1763_v3 = vld [vmem:[#allocation2 + $0x2e8] sm:$0xff]  ;;  %v1764_v12 = vld [vmem:[#allocation2 + $0x2f0] sm:$0xf] }
 0x5a8   :  { %1911 = vmatprep.subr.bf16.mxu0 %v2469_v32  ;;  %2672 = vmatprep.subr.bf16.mxu1 %v2470_v60  ;;  %v2475_v4 = vcombine.high %v1761_v63, %v1763_v3  ;;  %v2474_v13 = vcombine.low %v1761_v63, %v1763_v3  ;;  %v2476_v1 = vcombine.low %v1762_v11, %v1764_v12 }
 0x5ab   :  { %1912 = vmatpush1.bf16.msra.mxu0 %v2468_v59  ;;  %2673 = vmatpush3.bf16.msra.mxu1 %v2470_v60 }
 0x5ac   :  { %1913 = vmatprep.subr.bf16.mxu0 %v2472_v26  ;;  %2674 = vmatprep.subr.bf16.mxu1 %v2473_v22 }
 0x5ad   :  { %1637 = vmatmul.mubr.bf16.gmra.mrb[32].mxu0 %v1433_v51 }
 0x5ae   :  { %1941 = vmatprep.mubr.bf16.mxu0 %v2772_v0 }
 0x5af   :  { %1914 = vmatpush1.bf16.msra.mxu0 %v2471_v10  ;;  %2675 = vmatpush3.bf16.msra.mxu1 %v2473_v22 }
 0x5b0   :  { %1915 = vmatprep.subr.bf16.mxu0 %v2475_v4  ;;  %2676 = vmatprep.subr.bf16.mxu1 %v2476_v1 }
 0x5b3   :  { %1916 = vmatpush1.bf16.msra.mxu0 %v2474_v13  ;;  %2677 = vmatpush3.bf16.msra.mxu1 %v2476_v1 }
 0x5b4   :  { %1917 = vmatprep.subr.bf16.mxu0 %v2478_v2  ;;  %2678 = vmatprep.subr.bf16.mxu1 %v2479_v28 }
 0x5b7   :  { %1918 = vmatpush1.bf16.msra.mxu0 %v2477_v16  ;;  %2679 = vmatpush3.bf16.msra.mxu1 %v2479_v28 }
 0x5b8   :  { %1919 = vmatprep.subr.bf16.mxu0 %v2481_v25  ;;  %2680 = vmatprep.subr.bf16.mxu1 %v2482_v33 }
 0x5bb   :  { %1920 = vmatpush1.bf16.msra.mxu0 %v2480_v30  ;;  %2681 = vmatpush3.bf16.msra.mxu1 %v2482_v33 }
 0x5bc   :  { %1921 = vmatprep.subr.bf16.mxu0 %v2484_v7  ;;  %2682 = vmatprep.subr.bf16.mxu1 %v2485_v36 }
 0x5bf   :  { %1922 = vmatpush1.bf16.msra.mxu0 %v2483_v35  ;;  %2683 = vmatpush3.bf16.msra.mxu1 %v2485_v36  ;;  %v2038_v36 = vld [vmem:[#allocation2 + $0x174] sm:$0xff] }
 0x5c0   :  { %1923 = vmatprep.subr.bf16.mxu0 %v2487_v39  ;;  %2684 = vmatprep.subr.bf16.mxu1 %v2488_v44  ;;  %v2037_v39 = vld [vmem:[#allocation2 + $0x11c] sm:$0xf]  ;;  %v2494_v20 = vcombine.high %v2036_v55, %v2038_v36 }
 0x5c1   :  { %v2495_v48 = vcombine.low %v2037_v39, %v2039_v40 }
 0x5c3   :  { %1924 = vmatpush1.bf16.msra.mxu0 %v2486_v43  ;;  %2685 = vmatpush3.bf16.msra.mxu1 %v2488_v44 }
 0x5c4   :  { %2192 = vmatprep.subr.bf16.mxu0 %v2491_v46  ;;  %2690 = vmatprep.subr.bf16.mxu1 %v3096_v49 }
 0x678   :  { %v1628_v50 = vpop.f32.mrb[28].mxu0 }
 0x679   :  { %v1630_v51 = vpop.f32.mrb[29].mxu0  ;;  %v2668_v53 = vpop.f32.mrb[32].mxu1 }
 0x67a   :  { %v1632_v54 = vpop.f32.mrb[30].mxu0  ;;  %v1681_v32 = vpop.f32.mrb[33].mxu1  ;;  %v1700_v59 = vrot.slane %v1630_v51, 4  ;;  %v2043_v51 = vld [vmem:[#allocation2 + $0x23c] sm:$0xf] }
 0x67b   :  { %v1634_v57 = vpop.f32.mrb[31].mxu0  ;;  %v2669_v58 = vpop.f32.mrb[34].mxu1  ;;  %v2497_v54 = vcombine.high %v2040_v47, %v2042_v19 }
 0x67c   :  { %v1701_v60 = vrot.slane %v1634_v57, 4  ;;  %v1684_v61 = vpop.f32.mrb[35].mxu1 }
 0x67e   :  { %v1706_v6 = vsel %vm674_vm9, %v1700_v59, %v1701_v60 }
 0x67f   :  { %v1713_v26 = vadd.f32 %v1706_v6, %v1628_v50  ;;  %v2041_v50 = vld [vmem:[#allocation2 + $0x1dc] sm:$0xf] }
 0x680   :  { %v1638_v9 = vpop.f32.mrb[32].mxu0  ;;  %v2498_v57 = vcombine.low %v2041_v50, %v2043_v51 }
 0x681   :  { %v1717_v10 = vadd.f32 %v1713_v26, %v1684_v61  ;;  %v1640_v22 = vpop.f32.mrb[33].mxu0  ;;  %v2496_v61 = vcombine.low %v2040_v47, %v2042_v19 }
 0x682   :  { %v1702_v63 = vrot.slane %v1640_v22, 4  ;;  %v1642_v3 = vpop.f32.mrb[34].mxu0 }
 0x683   :  { %v1728_v4 = vadd.f32 %v2464_v8, %v1717_v10  ;;  %v1644_v11 = vpop.f32.mrb[35].mxu0  ;;  %v2054_v10 = vld [vmem:[#allocation2 + $0x474] sm:$0xff]  ;;  %v2051_v3 = vld [vmem:[#allocation2 + $0x3bc] sm:$0xf] }
 0x684   :  { %v1705_v12 = vsel %vm674_vm9, %v1701_v60, %v1702_v63  ;;  %v1703_v13 = vrot.slane %v1644_v11, 4  ;;  %v2047_v60 = vld [vmem:[#allocation2 + $0x2fc] sm:$0xf] }
 0x685   :  { %v1732_v1 = vmax.f32 %v1728_v4, 0.0  ;;  %v1710_v15 = vsel %vm668_vm10, %v1705_v12, 0.0  ;;  %v2056_v12 = vld [vmem:[#allocation2 + $0x4d4] sm:$0xff] }
 0x686   :  { %v1718_v2 = vadd.f32 %v2668_v53, %v1710_v15  ;;  %v1704_v17 = vsel %vm674_vm9, %v1702_v63, %v1703_v13  ;;  %v1707_v21 = vsel %vm674_vm9, %v1703_v13, %v1700_v59  ;;  %v2493_v53 = vcombine.low %v2036_v55, %v2038_v36  ;;  %v2045_v59 = vld [vmem:[#allocation2 + $0x29c] sm:$0xf]  ;;  %v2058_v13 = vld [vmem:[#allocation2 + $0x534] sm:$0xff] }
 0x687   :  { %v1740_v16 = vadd.f32 %v1736_v14, %v1732_v1  ;;  %v1708_v28 = vsel %vm666_vm11, %v1707_v21, 0.0  ;;  %v1715_v23 = vadd.f32 %v1704_v17, %v1638_v9  ;;  %v2501_v26 = vcombine.low %v2045_v59, %v2047_v60  ;;  %v2052_v9 = vld [vmem:[#allocation2 + $0x414] sm:$0xff]  ;;  %v2049_v63 = vld [vmem:[#allocation2 + $0x35c] sm:$0xf] }
 0x688   :  { %v1729_v24 = vadd.f32 %v2464_v8, %v1718_v2  ;;  %v1716_v25 = vadd.f32 %v1708_v28, %v1681_v32  ;;  %v2044_v32 = vld [vmem:[#allocation2 + $0x294] sm:$0xff]  ;;  %v2506_v22 = vcombine.high %v2052_v9, %v2054_v10  ;;  %v2505_v4 = vcombine.low %v2052_v9, %v2054_v10  ;;  %v2053_v14 = vld [vmem:[#allocation2 + $0x41c] sm:$0xf] }
 0x689   :  { %v1719_v27 = vadd.f32 %v2669_v58, %v1715_v23  ;;  %v1744_v37 = vmax.f32 %v1740_v16, 0.0  ;;  %v2046_v58 = vld [vmem:[#allocation2 + $0x2f4] sm:$0xff]  ;;  %v2504_v11 = vcombine.low %v2049_v63, %v2051_v3  ;;  %v2509_v1 = vcombine.high %v2056_v12, %v2058_v13  ;;  %v2055_v15 = vld [vmem:[#allocation2 + $0x47c] sm:$0xf] }
 0x68a   :  { %v1733_v29 = vmax.f32 %v1729_v24, 0.0  ;;  %v1727_v30 = vadd.f32 %v2464_v8, %v1716_v25  ;;  %v2500_v6 = vcombine.high %v2044_v32, %v2046_v58  ;;  %v2508_v2 = vcombine.low %v2056_v12, %v2058_v13  ;;  %v2060_v21 = vld [vmem:[#allocation2 + $0x594] sm:$0xff]  ;;  %v2057_v23 = vld [vmem:[#allocation2 + $0x4dc] sm:$0xf] }
 0x68b   :  { %v1730_v33 = vadd.f32 %v2464_v8, %v1719_v27  ;;  %v2502_v8 = vcombine.low %v2048_v41, %v2050_v45  ;;  %v2507_v17 = vcombine.low %v2053_v14, %v2055_v15  ;;  %v2062_v16 = vld [vmem:[#allocation2 + $0x5f4] sm:$0xff]  ;;  %v2059_v24 = vld [vmem:[#allocation2 + $0x53c] sm:$0xf] }
 0x68c   :  { %v1731_v5 = vmax.f32 %v1727_v30, 0.0  ;;  %v1741_v7 = vadd.f32 %v1737_v52, %v1733_v29  ;;  %v2512_v28 = vcombine.high %v2060_v21, %v2062_v16  ;;  %v2511_v25 = vcombine.low %v2060_v21, %v2062_v16  ;;  %v2061_v29 = vld [vmem:[#allocation2 + $0x59c] sm:$0xf] }
 0x68d   :  { %v1734_v56 = vmax.f32 %v1730_v33, 0.0  ;;  %v2510_v27 = vcombine.low %v2057_v23, %v2059_v24  ;;  %v2063_v30 = vld [vmem:[#allocation2 + $0x5fc] sm:$0xf] }
 0x68e   :  { %v1739_v34 = vadd.f32 %v1735_v62, %v1731_v5  ;;  %v1745_v42 = vmax.f32 %v1741_v7, 0.0  ;;  %v2513_v52 = vcombine.low %v2061_v29, %v2063_v30  ;;  %v2489_v7 = vld [vmem:[%s3157_s2 + $0x8] ss:$0 sm:$0xff] }
 0x68f   :  { %v1742_v35 = vadd.f32 %v1738_v18, %v1734_v56 }
 0x690   :  { %v1743_v38 = vmax.f32 %v1739_v34, 0.0 }
 0x691   :  { %v1746_v43 = vmax.f32 %v1742_v35, 0.0 }
 0x692   :  { %v3118_v44 = vpack.c.bf16 %v1744_v37, %v1743_v38 }
 0x693   :  { %v3120_v46 = vpack.c.bf16 %v1746_v43, %v1745_v42 }
 0x694   :  { %1942 = vmatmul.mubr.bf16.vlgmr.msra.gmra.mrb[36].mxu0 %v3118_v44  ;;  %2686 = vmatprep.mubr.bf16.mxu1 %v3118_v44  ;;  %v2314_v16 = vunpack.c.h.bf16 %v3118_v44 }
 0x695   :  { %2687 = vmatmul.mubr.bf16.vlgmr.msra.gmra.mrb[36].mxu1 %v3120_v46  ;;  %1949 = vmatprep.mubr.bf16.mxu0 %v2772_v0  ;;  %v2316_v23 = vunpack.c.h.bf16 %v3120_v46 }
 0x696   :  { %2193 = vmatpush1.bf16.msra.mxu0 %v2490_v31  ;;  %2691 = vmatpush3.bf16.msra.mxu1 %v3096_v49  ;;  %v2499_v31 = vcombine.low %v2044_v32, %v2046_v58  ;;  %v2503_v49 = vcombine.high %v2048_v41, %v2050_v45 }
 0x697   :  { %2194 = vmatprep.subr.bf16.mxu0 %v2494_v20  ;;  %2692 = vmatprep.subr.bf16.mxu1 %v2495_v48 }
 0x69a   :  { %2195 = vmatpush1.bf16.msra.mxu0 %v2493_v53  ;;  %2693 = vmatpush3.bf16.msra.mxu1 %v2495_v48 }
 0x69b   :  { %2196 = vmatprep.subr.bf16.mxu0 %v2497_v54  ;;  %2694 = vmatprep.subr.bf16.mxu1 %v2498_v57 }
 0x69c   :  { %1950 = vmatmul.mubr.bf16.gmra.mrb[40].mxu0 %v3120_v46 }
 0x69d   :  { %2224 = vmatprep.mubr.bf16.mxu0 %v2772_v0 }
 0x69e   :  { %2197 = vmatpush1.bf16.msra.mxu0 %v2496_v61  ;;  %2695 = vmatpush3.bf16.msra.mxu1 %v2498_v57  ;;  %v2514_v61 = vld [vmem:[%s3157_s2 + $0x9] ss:$0 sm:$0xff]  ;;  %s2774_s2 = smov [#allocation5]  }
 0x69f   :  { %2198 = vmatprep.subr.bf16.mxu0 %v2500_v6  ;;  %2696 = vmatprep.subr.bf16.mxu1 %v2501_v26  ;;  %s2334_s26 = sshll.u32 %s2774_s2, 4  ;;  %s2335_s26 = int_to_ptr.vmem [resolvable:$true] %s2334_s26 }
 0x6a0   :  { %s2743_s27 = scalar_lea.vmem %s2335_s26, 512  ;;  %p2748_p9 = scmp.lt.s32.totalorder %s2335_s26, %s2335_s26 }
 0x6a1   :  { %p2744_p8 = scmp.ne.s32.totalorder %s2335_s26, %s2743_s27  ;;  %p2749_p10 = scmp.lt.s32.totalorder %s2743_s27, %s2743_s27 }
 0x6a2   :  { %2199 = vmatpush1.bf16.msra.mxu0 %v2499_v31  ;;  %2697 = vmatpush3.bf16.msra.mxu1 %v2501_v26 }
 0x6a3   :  { %2200 = vmatprep.subr.bf16.mxu0 %v2503_v49  ;;  %2698 = vmatprep.subr.bf16.mxu1 %v2504_v11  ;;  %p2750_p11 = por %p2749_p10, %p2748_p9 }
 0x6a5   :  { %p2751_p12 = pnand %p2750_p11, %p2744_p8 }
 0x6a6   :  { %2201 = vmatpush1.bf16.msra.mxu0 %v2502_v8  ;;  %2699 = vmatpush3.bf16.msra.mxu1 %v2504_v11  ;;  %v2315_v8 = vunpack.c.l.bf16 %v3120_v46 }
 0x6a7   :  { %2202 = vmatprep.subr.bf16.mxu0 %v2506_v22  ;;  %2700 = vmatprep.subr.bf16.mxu1 %v2507_v17  ;;  %v2313_v22 = vunpack.c.l.bf16 %v3118_v44 }
 0x6aa   :  { %2203 = vmatpush1.bf16.msra.mxu0 %v2505_v4  ;;  %2701 = vmatpush3.bf16.msra.mxu1 %v2507_v17 }
 0x6ab   :  { %2204 = vmatprep.subr.bf16.mxu0 %v2509_v1  ;;  %2702 = vmatprep.subr.bf16.mxu1 %v2510_v27 }
 0x6ae   :  { %2205 = vmatpush1.bf16.msra.mxu0 %v2508_v2  ;;  %2703 = vmatpush3.bf16.msra.mxu1 %v2510_v27 }
 0x6af   :  { %2206 = vmatprep.subr.bf16.mxu0 %v2512_v28  ;;  %2704 = vmatprep.subr.bf16.mxu1 %v2513_v52 }
 0x6b2   :  { %2207 = vmatpush1.bf16.msra.mxu0 %v2511_v25  ;;  %2705 = vmatpush3.bf16.msra.mxu1 %v2513_v52 }
 0x767   :  { %v1943_v33 = vpop.f32.mrb[36].mxu0 }
 0x768   :  { %v1944_v62 = vpop.f32.mrb[37].mxu0  ;;  %v2688_v5 = vpop.f32.mrb[36].mxu1 }
 0x769   :  { %v1946_v56 = vpop.f32.mrb[38].mxu0  ;;  %v1992_v18 = vpop.f32.mrb[37].mxu1  ;;  %v2024_v20 = vadd.f32 %v2688_v5, %v2489_v7 }
 0x76a   :  { %v1947_v34 = vpop.f32.mrb[39].mxu0  ;;  %v2689_v35 = vpop.f32.mrb[38].mxu1  ;;  %v2022_v36 = vadd.f32 %v2489_v7, %v1992_v18 }
 0x76b   :  { %v1995_v55 = vpop.f32.mrb[39].mxu1  ;;  %v2028_v53 = vmax.f32 %v2024_v20, 0.0 }
 0x76c   :  { %v2012_v37 = vadd.f32 %v1995_v55, %v1944_v62  ;;  %v2026_v40 = vmax.f32 %v2022_v36, 0.0 }
 0x76e   :  { %v2023_v38 = vadd.f32 %v2489_v7, %v2012_v37 }
 0x76f   :  { %v1951_v39 = vpop.f32.mrb[40].mxu0 }
 0x770   :  { %v2027_v42 = vmax.f32 %v2023_v38, 0.0  ;;  %v1952_v43 = vpop.f32.mrb[41].mxu0 }
 0x771   :  { %v2014_v47 = vadd.f32 %v2689_v35, %v1952_v43  ;;  %v1954_v48 = vpop.f32.mrb[42].mxu0 }
 0x772   :  { %v2030_v19 = vpack.c.bf16 %v2027_v42, %v2026_v40  ;;  %v1955_v50 = vpop.f32.mrb[43].mxu0 }
 0x773   :  { %v2025_v51 = vadd.f32 %v2489_v7, %v2014_v47 }
 0x774   :  { %2225 = vmatmul.mubr.bf16.vlgmr.msra.gmra.mrb[44].mxu0 %v2030_v19  ;;  %2706 = vmatprep.mubr.bf16.mxu1 %v2030_v19 }
 0x775   :  { %v2029_v54 = vmax.f32 %v2025_v51, 0.0  ;;  %2232 = vmatprep.mubr.bf16.mxu0 %v2772_v0 }
 0x777   :  { %v2031_v32 = vpack.c.bf16 %v2029_v54, %v2028_v53 }
 0x779   :  { %2707 = vmatmul.mubr.bf16.vlgmr.msra.gmra.mrb[40].mxu1 %v2031_v32 }
 0x77c   :  { %2233 = vmatmul.mubr.bf16.gmra.mrb[48].mxu0 %v2031_v32 }
 0x847   :  { %v2226_v57 = vpop.f32.mrb[44].mxu0 }
 0x848   :  { %v2227_v58 = vpop.f32.mrb[45].mxu0 }
 0x849   :  { %v2229_v59 = vpop.f32.mrb[46].mxu0 }
 0x84a   :  { %v2230_v60 = vpop.f32.mrb[47].mxu0 }
 0x84c   :  { %v2708_v6 = vpop.f32.mrb[40].mxu1 }
 0x84d   :  { %v2307_v26 = vadd.f32 %v2708_v6, %v2514_v61  ;;  %v2275_v41 = vpop.f32.mrb[41].mxu1 }
 0x84e   :  { %v2305_v45 = vadd.f32 %v2514_v61, %v2275_v41  ;;  %v2709_v31 = vpop.f32.mrb[42].mxu1 }
 0x84f   :  { %v2311_v49 = vmax.f32 %v2307_v26, 0.0  ;;  %v2234_v0 = vpop.f32.mrb[48].mxu0  ;;  %v2278_v9 = vpop.f32.mrb[43].mxu1 }
 0x850   :  { %v2309_v10 = vmax.f32 %v2305_v45, 0.0  ;;  %v2295_v63 = vadd.f32 %v2278_v9, %v2227_v58  ;;  %v2235_v3 = vpop.f32.mrb[49].mxu0 }
 0x851   :  { %v2319_v4 = vadd.f32 %v2315_v8, %v2311_v49  ;;  %v2297_v11 = vadd.f32 %v2709_v31, %v2235_v3  ;;  %v2237_v12 = vpop.f32.mrb[50].mxu0 }
 0x852   :  { %v2317_v13 = vadd.f32 %v2313_v22, %v2309_v10  ;;  %v2306_v1 = vadd.f32 %v2514_v61, %v2295_v63  ;;  %v2238_v14 = vpop.f32.mrb[51].mxu0 }
 0x853   :  { %v2323_v15 = vmax.f32 %v2319_v4, 0.0  ;;  %v2308_v2 = vadd.f32 %v2514_v61, %v2297_v11 }
 0x854   :  { %v2321_v17 = vmax.f32 %v2317_v13, 0.0  ;;  %v2310_v21 = vmax.f32 %v2306_v1, 0.0 }
 0x855   :  { %2327 = vst [vmem:[#allocation5 + $0x10] sm:$0xff] %v2323_v15  ;;  %v2312_v28 = vmax.f32 %v2308_v2, 0.0 }
 0x856   :  { %2325 = vst [vmem:[#allocation5] sm:$0xff] %v2321_v17  ;;  %v2318_v24 = vadd.f32 %v2314_v16, %v2310_v21 }
 0x857   :  { %v2320_v25 = vadd.f32 %v2316_v23, %v2312_v28 }
 0x858   :  { %v2322_v27 = vmax.f32 %v2318_v24, 0.0 }
 0x859   :  { %v2324_v29 = vmax.f32 %v2320_v25, 0.0 }
 0x85a   :  { %2326 = vst [vmem:[#allocation5 + $0x8] sm:$0xff] %v2322_v27 }
 0x85b   :  { %2328 = vst [vmem:[#allocation5 + $0x18] sm:$0xff] %v2324_v29 }
 0x85c   :  { %2754 = shalt.err (!%p2751_p12)
}
 0x85d   :  { %s2755_s1 = scalar_lea.hbm %s3158_s3, 512 }
 0x85e   :  { %p2756_p13 = scmp.ne.s32.totalorder %s3158_s3, %s2755_s1  ;;  %p2759_p0 = scmp.lt.u32.totalorder %s2755_s1, %s3158_s3 }
 0x860   :  { %p2761_p1 = pnand %p2759_p0, %p2756_p13 }
 0x862   :  { %2764 = shalt.err (!%p2761_p1)
}
 0x863   :  { %s2775_s6 = smov 128   ;;  %s2776_s7 = smov 8  }
 0x864   :  { %2340 = dma.vmem_to_hbm [thread:$0]  %s2335_s26, 512, %s3158_s3, [#allocation4], %s2775_s6, %s2775_s6, %s2776_s7  }
 0x865   :  { %2767 = dma.done.wait [#allocation4], 512  }
 0x866   :  { %2768 = vsyncadd [#allocation4], 4294966784 }
 0x867   :  { %2344 = vsyncpa [#allocation3], 1 }
 0x868   :  { %2345 = vsyncpa [#allocation4], 1 }

</bundles_post_ra>
